<compile_context>
chip_gen: v7x
topology: tpu7x:2x2x1
jax: 0.10.0
libtpu: 0.0.40
codegen_flags: <defaults>
</compile_context>

<pallas_src>
import functools

import jax
import jax.numpy as jnp
from jax.experimental import pallas as pl
from jax.experimental.pallas import tpu as pltpu


def _round_up(x, m):
    return ((x + m - 1) // m) * m


def _pi_mlp_kernel(x_ref, w1_ref, b1_ref, w2_ref, b2_ref, w3_ref, b3_ref,
                   out_ref, *, act):
    """Fused 3-layer MLP on one [Bt, enc] tile -> one lane-dense [Bt, 128] tile."""
    mxu_dtype = w1_ref.dtype  # bf16 on the fast path, f32 on the strict path

    def _act(h):
        if act == "relu":
            return jnp.maximum(h, 0.0)      # VPU
        if act == "tanh":
            return jnp.tanh(h)              # EUP
        return h                            # act=None -> pure-linear MLP

    def _layer(x, w_ref, b_ref, apply_act):
        h = jnp.dot(x.astype(mxu_dtype), w_ref[...],
                    preferred_element_type=jnp.float32)      # MXU, f32 accum
        h = h + b_ref[...].astype(jnp.float32)
        return _act(h) if apply_act else h

    h = _layer(x_ref[...], w1_ref, b1_ref, True)
    h = _layer(h, w2_ref, b2_ref, True)
    out = _layer(h, w3_ref, b3_ref, False)
    out_ref[...] = out.astype(out_ref.dtype)


def prepare_params(params, action_size, matmul_dtype=jnp.bfloat16):
    """One-time param prep (hoisted out of the per-call path):
       * zero-pad W3/b3 to a full 128-lane output (lane-dense unmasked store),
       * pre-cast weight matrices for the MXU (bf16 by default, None = keep)."""
    w1, b1, w2, b2, w3, b3 = params
    out_dim = 2 * action_size
    if w3.shape[1] % 128 != 0:
        pad = _round_up(out_dim, 128) - w3.shape[1]
        w3 = jnp.pad(w3, ((0, 0), (0, pad)))
        b3 = jnp.pad(b3, ((0, 0), (0, pad)))
    if matmul_dtype is not None:
        w1, w2, w3 = (w.astype(matmul_dtype) for w in (w1, w2, w3))
    return w1, b1, w2, b2, w3, b3


def pointnet_pi_forward(encoding, params, action_size, act="relu",
                        block_batch=None):
    """encoding: [B, encoding_size] -> {"mean": [B, A], "log_std": [B, A]}."""
    w1, b1, w2, b2, w3, b3 = params
    batch, enc_size = encoding.shape
    h1, h2 = w1.shape[1], w2.shape[1]
    out_dim = 2 * action_size

    if w3.shape[1] % 128 != 0:
        # Un-prepared params; pad here as a fallback (prefer prepare_params so
        # this scatter/copy does not re-run on every forward call).
        pad = _round_up(out_dim, 128) - w3.shape[1]
        w3 = jnp.pad(w3, ((0, 0), (0, pad)))
        b3 = jnp.pad(b3, ((0, 0), (0, pad)))
    out_pad = w3.shape[1]

    # Batch tile: multiple of sublane packing, targeting >= 2 grid steps (v7x
    # megacore) and capped at 2048 rows (fits v5e's 16 MiB default scoped VMEM).
    sub = 16 if encoding.dtype == jnp.bfloat16 else 8
    if block_batch is None:
        block_batch = min(2048, max(sub, _round_up(pl.cdiv(batch, 2), sub)))
    block_batch = max(sub, _round_up(block_batch, sub))
    grid = (pl.cdiv(batch, block_batch),)     # ragged edge handled by Pallas

    kernel = functools.partial(_pi_mlp_kernel, act=act)

    def _call(single_buffer_weights):
        kw = {}
        if single_buffer_weights and hasattr(pl, "Buffered"):
            # Constant index_map -> weights never change across the grid; one
            # in-flight buffer is enough (saves ~0.8 MiB f32 of VMEM).
            kw = dict(pipeline_mode=pl.Buffered(buffer_count=1))
        resident = lambda shape: pl.BlockSpec(shape, lambda i: (0, 0), **kw)
        return pl.pallas_call(
            kernel,
            out_shape=jax.ShapeDtypeStruct((batch, out_pad), encoding.dtype),
            grid=grid,
            in_specs=[
                pl.BlockSpec((block_batch, enc_size), lambda i: (i, 0)),  # x
                resident((enc_size, h1)), resident((1, h1)),              # L1
                resident((h1, h2)), resident((1, h2)),                    # L2
                resident((h2, out_pad)), resident((1, out_pad)),          # L3
            ],
            out_specs=pl.BlockSpec((block_batch, out_pad), lambda i: (i, 0)),
            compiler_params=pltpu.CompilerParams(
                dimension_semantics=("parallel",)),
        )(encoding, w1, b1, w2, b2, w3, b3)

    try:
        out = _call(True)
    except Exception:
        # This JAX build rejects Buffered(1): fall back to default buffering.
        out = _call(False)

    # PiModelOutputs(mean=output[:, :A], log_std=output[:, A:]) -- free XLA slice.
    return {"mean": out[:, :action_size],
            "log_std": out[:, action_size:out_dim]}


def init_params(key, encoding_size, hidden_sizes, action_size,
                dtype=jnp.float32):
    """Deterministic PyTorch-Linear-style (uniform +-1/sqrt(fan_in)) init."""
    dims = [encoding_size] + list(hidden_sizes) + [2 * action_size]
    params = []
    for din, dout in zip(dims[:-1], dims[1:]):
        key, kw, kb = jax.random.split(key, 3)
        bound = 1.0 / float(din) ** 0.5
        w = jax.random.uniform(kw, (din, dout), jnp.float32, -bound, bound)
        b = jax.random.uniform(kb, (1, dout), jnp.float32, -bound, bound)
        params += [w.astype(dtype), b.astype(dtype)]
    return params


def _reference_forward(encoding, params, action_size, act="relu"):
    """Pure-JAX f32 reference matching the PyTorch module."""
    w1, b1, w2, b2, w3, b3 = (p.astype(jnp.float32) for p in params)
    h = encoding.astype(jnp.float32) @ w1 + b1
    if act == "relu":
        h = jnp.maximum(h, 0.0)
    elif act == "tanh":
        h = jnp.tanh(h)
    h = h @ w2 + b2
    if act == "relu":
        h = jnp.maximum(h, 0.0)
    elif act == "tanh":
        h = jnp.tanh(h)
    out = h @ w3 + b3
    return out[:, :action_size], out[:, action_size:]


if __name__ == "__main__":
    # Shapes consistent with the module: encoding [B, encoding_size],
    # default hidden sizes [512, 256], continuous action of dim 8.
    encoding_size = 64
    hidden_sizes = [512, 256]
    action_size = 8
    hidden_nonlinearity = "relu"

    key = jax.random.PRNGKey(0)
    key, k1, k2 = jax.random.split(key, 3)
    params = init_params(key, encoding_size, hidden_sizes, action_size)

    # --- test 1: strict-f32 matmul path, small batch, single grid step ------
    batch = 8
    enc = jax.random.normal(k1, (batch, encoding_size), jnp.float32)
    p_f32 = prepare_params(params, action_size, matmul_dtype=None)
    outs = pointnet_pi_forward(enc, p_f32, action_size,
                               act=hidden_nonlinearity)
    jax.block_until_ready(outs)
    ref_m, ref_s = _reference_forward(enc, params, action_size,
                                      act=hidden_nonlinearity)
    assert outs["mean"].shape == (batch, action_size)
    assert outs["log_std"].shape == (batch, action_size)
    assert jnp.allclose(outs["mean"], ref_m, atol=1e-4, rtol=1e-4)
    assert jnp.allclose(outs["log_std"], ref_s, atol=1e-4, rtol=1e-4)

    # --- test 2: ragged batch, default bf16-MXU fast path, 2-step grid ------
    batch2 = 300
    enc2 = jax.random.normal(k2, (batch2, encoding_size), jnp.float32)
    p_fast = prepare_params(params, action_size)        # bf16 weights, padded once
    outs2 = pointnet_pi_forward(enc2, p_fast, action_size,
                                act=hidden_nonlinearity)
    jax.block_until_ready(outs2)
    ref2_m, ref2_s = _reference_forward(enc2, params, action_size,
                                        act=hidden_nonlinearity)
    assert outs2["mean"].shape == (batch2, action_size)
    assert outs2["log_std"].shape == (batch2, action_size)
    assert jnp.allclose(outs2["mean"], ref2_m, atol=1e-1, rtol=1e-1)
    assert jnp.allclose(outs2["log_std"], ref2_s, atol=1e-1, rtol=1e-1)

    # --- test 3: bf16 activations end-to-end, explicit tile, ragged edge ----
    outs3 = pointnet_pi_forward(enc2.astype(jnp.bfloat16), p_fast, action_size,
                                act=hidden_nonlinearity, block_batch=128)
    jax.block_until_ready(outs3)
    assert jnp.allclose(outs3["mean"].astype(jnp.float32), ref2_m,
                        atol=1e-1, rtol=1e-1)
    assert jnp.allclose(outs3["log_std"].astype(jnp.float32), ref2_s,
                        atol=1e-1, rtol=1e-1)

    print("KERNEL_OK")
</pallas_src>

<mosaic_0001>
module attributes {stable_mosaic.version = 11 : i64} {
  func.func @_pi_mlp_kernel(%arg0: i32, %arg1: memref<8x64xf32, #tpu.memory_space<vmem>>, %arg2: memref<64x512xf32, #tpu.memory_space<vmem>>, %arg3: memref<1x512xf32, #tpu.memory_space<vmem>>, %arg4: memref<512x256xf32, #tpu.memory_space<vmem>>, %arg5: memref<1x256xf32, #tpu.memory_space<vmem>>, %arg6: memref<256x128xf32, #tpu.memory_space<vmem>>, %arg7: memref<1x128xf32, #tpu.memory_space<vmem>>, %arg8: memref<8x128xf32, #tpu.memory_space<vmem>>) attributes {dimension_semantics = [#tpu.dimension_semantics<parallel>], iteration_bounds = array<i64: 1>, scalar_prefetch = 0 : i64, scratch_operands = 0 : i64, tpu.core_type = #tpu.core_type<tc>, window_params = [{transform_indices = @transform_0, window_bounds = array<i64: 8, 64>}, {pipeline_mode = #tpu.pipeline_mode<synchronous>, transform_indices = @transform_1, window_bounds = array<i64: 64, 512>}, {pipeline_mode = #tpu.pipeline_mode<synchronous>, transform_indices = @transform_2, window_bounds = array<i64: 1, 512>}, {pipeline_mode = #tpu.pipeline_mode<synchronous>, transform_indices = @transform_3, window_bounds = array<i64: 512, 256>}, {pipeline_mode = #tpu.pipeline_mode<synchronous>, transform_indices = @transform_4, window_bounds = array<i64: 1, 256>}, {pipeline_mode = #tpu.pipeline_mode<synchronous>, transform_indices = @transform_5, window_bounds = array<i64: 256, 128>}, {pipeline_mode = #tpu.pipeline_mode<synchronous>, transform_indices = @transform_6, window_bounds = array<i64: 1, 128>}, {transform_indices = @transform_7, window_bounds = array<i64: 8, 128>}]} {
    %c0 = arith.constant 0 : index
    %c0_0 = arith.constant 0 : index
    %0 = vector.load %arg1[%c0, %c0_0] : memref<8x64xf32, #tpu.memory_space<vmem>>, vector<8x64xf32>
    %c0_1 = arith.constant 0 : index
    %c0_2 = arith.constant 0 : index
    %1 = vector.load %arg2[%c0_1, %c0_2] : memref<64x512xf32, #tpu.memory_space<vmem>>, vector<64x512xf32>
    %cst = arith.constant dense<0.000000e+00> : vector<8x512xf32>
    %2 = tpu.matmul %0, %1, %cst {dimension_numbers = #tpu.dot_dimension_numbers<[1], [0], [0], [1], [0, 0, 1, 1], [], []>} : vector<8x64xf32>, vector<64x512xf32>, vector<8x512xf32> -> vector<8x512xf32>
    %c0_3 = arith.constant 0 : index
    %c0_4 = arith.constant 0 : index
    %3 = vector.load %arg3[%c0_3, %c0_4] : memref<1x512xf32, #tpu.memory_space<vmem>>, vector<1x512xf32>
    %4 = vector.broadcast %3 : vector<1x512xf32> to vector<8x512xf32>
    %5 = arith.addf %2, %4 : vector<8x512xf32>
    %cst_5 = arith.constant 0.000000e+00 : f32
    %6 = vector.broadcast %cst_5 : f32 to vector<8x512xf32>
    %7 = arith.maximumf %5, %6 : vector<8x512xf32>
    %c0_6 = arith.constant 0 : index
    %c0_7 = arith.constant 0 : index
    %8 = vector.load %arg4[%c0_6, %c0_7] : memref<512x256xf32, #tpu.memory_space<vmem>>, vector<512x256xf32>
    %cst_8 = arith.constant dense<0.000000e+00> : vector<8x256xf32>
    %9 = tpu.matmul %7, %8, %cst_8 {dimension_numbers = #tpu.dot_dimension_numbers<[1], [0], [0], [1], [0, 0, 1, 1], [], []>} : vector<8x512xf32>, vector<512x256xf32>, vector<8x256xf32> -> vector<8x256xf32>
    %c0_9 = arith.constant 0 : index
    %c0_10 = arith.constant 0 : index
    %10 = vector.load %arg5[%c0_9, %c0_10] : memref<1x256xf32, #tpu.memory_space<vmem>>, vector<1x256xf32>
    %11 = vector.broadcast %10 : vector<1x256xf32> to vector<8x256xf32>
    %12 = arith.addf %9, %11 : vector<8x256xf32>
    %cst_11 = arith.constant 0.000000e+00 : f32
    %13 = vector.broadcast %cst_11 : f32 to vector<8x256xf32>
    %14 = arith.maximumf %12, %13 : vector<8x256xf32>
    %c0_12 = arith.constant 0 : index
    %c0_13 = arith.constant 0 : index
    %15 = vector.load %arg6[%c0_12, %c0_13] : memref<256x128xf32, #tpu.memory_space<vmem>>, vector<256x128xf32>
    %cst_14 = arith.constant dense<0.000000e+00> : vector<8x128xf32>
    %16 = tpu.matmul %14, %15, %cst_14 {dimension_numbers = #tpu.dot_dimension_numbers<[1], [0], [0], [1], [0, 0, 1, 1], [], []>} : vector<8x256xf32>, vector<256x128xf32>, vector<8x128xf32> -> vector<8x128xf32>
    %c0_15 = arith.constant 0 : index
    %c0_16 = arith.constant 0 : index
    %17 = vector.load %arg7[%c0_15, %c0_16] : memref<1x128xf32, #tpu.memory_space<vmem>>, vector<1x128xf32>
    %18 = vector.broadcast %17 : vector<1x128xf32> to vector<8x128xf32>
    %19 = arith.addf %16, %18 : vector<8x128xf32>
    %c0_17 = arith.constant 0 : index
    %c0_18 = arith.constant 0 : index
    %20 = vector.load %arg8[%c0_17, %c0_18] : memref<8x128xf32, #tpu.memory_space<vmem>>, vector<8x128xf32>
    tpu.vector_store %arg8[%c0_17, %c0_18], %19 {strides = array<i32>} : memref<8x128xf32, #tpu.memory_space<vmem>>, vector<8x128xf32>,
    return
  }
  func.func @transform_0(%arg0: i32) -> (i32, i32) {
    %c0_i32 = arith.constant 0 : i32
    %c0_i32_0 = arith.constant 0 : i32
    return %arg0, %c0_i32 : i32, i32
  }
  func.func @transform_1(%arg0: i32) -> (i32, i32) {
    %c0_i32 = arith.constant 0 : i32
    %c0_i32_0 = arith.constant 0 : i32
    %c0_i32_1 = arith.constant 0 : i32
    return %c0_i32, %c0_i32_0 : i32, i32
  }
  func.func @transform_2(%arg0: i32) -> (i32, i32) {
    %c0_i32 = arith.constant 0 : i32
    %c0_i32_0 = arith.constant 0 : i32
    %c0_i32_1 = arith.constant 0 : i32
    return %c0_i32, %c0_i32_0 : i32, i32
  }
  func.func @transform_3(%arg0: i32) -> (i32, i32) {
    %c0_i32 = arith.constant 0 : i32
    %c0_i32_0 = arith.constant 0 : i32
    %c0_i32_1 = arith.constant 0 : i32
    return %c0_i32, %c0_i32_0 : i32, i32
  }
  func.func @transform_4(%arg0: i32) -> (i32, i32) {
    %c0_i32 = arith.constant 0 : i32
    %c0_i32_0 = arith.constant 0 : i32
    %c0_i32_1 = arith.constant 0 : i32
    return %c0_i32, %c0_i32_0 : i32, i32
  }
  func.func @transform_5(%arg0: i32) -> (i32, i32) {
    %c0_i32 = arith.constant 0 : i32
    %c0_i32_0 = arith.constant 0 : i32
    %c0_i32_1 = arith.constant 0 : i32
    return %c0_i32, %c0_i32_0 : i32, i32
  }
  func.func @transform_6(%arg0: i32) -> (i32, i32) {
    %c0_i32 = arith.constant 0 : i32
    %c0_i32_0 = arith.constant 0 : i32
    %c0_i32_1 = arith.constant 0 : i32
    return %c0_i32, %c0_i32_0 : i32, i32
  }
  func.func @transform_7(%arg0: i32) -> (i32, i32) {
    %c0_i32 = arith.constant 0 : i32
    %c0_i32_0 = arith.constant 0 : i32
    return %arg0, %c0_i32 : i32, i32
  }
}

module attributes {stable_mosaic.version = 11 : i64} {
  func.func @_pi_mlp_kernel(%arg0: i32, %arg1: memref<8x64xf32, #tpu.memory_space<vmem>>, %arg2: memref<64x512xf32, #tpu.memory_space<vmem>>, %arg3: memref<1x512xf32, #tpu.memory_space<vmem>>, %arg4: memref<512x256xf32, #tpu.memory_space<vmem>>, %arg5: memref<1x256xf32, #tpu.memory_space<vmem>>, %arg6: memref<256x128xf32, #tpu.memory_space<vmem>>, %arg7: memref<1x128xf32, #tpu.memory_space<vmem>>, %arg8: memref<8x128xf32, #tpu.memory_space<vmem>>) attributes {dimension_semantics = [#tpu.dimension_semantics<parallel>], iteration_bounds = array<i64: 1>, scalar_prefetch = 0 : i64, scratch_operands = 0 : i64, tpu.core_type = #tpu.core_type<tc>, window_params = [{transform_indices = @transform_0, window_bounds = array<i64: 8, 64>}, {pipeline_mode = #tpu.pipeline_mode<synchronous>, transform_indices = @transform_1, window_bounds = array<i64: 64, 512>}, {pipeline_mode = #tpu.pipeline_mode<synchronous>, transform_indices = @transform_2, window_bounds = array<i64: 1, 512>}, {pipeline_mode = #tpu.pipeline_mode<synchronous>, transform_indices = @transform_3, window_bounds = array<i64: 512, 256>}, {pipeline_mode = #tpu.pipeline_mode<synchronous>, transform_indices = @transform_4, window_bounds = array<i64: 1, 256>}, {pipeline_mode = #tpu.pipeline_mode<synchronous>, transform_indices = @transform_5, window_bounds = array<i64: 256, 128>}, {pipeline_mode = #tpu.pipeline_mode<synchronous>, transform_indices = @transform_6, window_bounds = array<i64: 1, 128>}, {transform_indices = @transform_7, window_bounds = array<i64: 8, 128>}]} {
    %c0 = arith.constant 0 : index
    %c0_0 = arith.constant 0 : index
    %0 = vector.load %arg1[%c0, %c0_0] : memref<8x64xf32, #tpu.memory_space<vmem>>, vector<8x64xf32>
    %c0_1 = arith.constant 0 : index
    %c0_2 = arith.constant 0 : index
    %1 = vector.load %arg2[%c0_1, %c0_2] : memref<64x512xf32, #tpu.memory_space<vmem>>, vector<64x512xf32>
    %cst = arith.constant dense<0.000000e+00> : vector<8x512xf32>
    %2 = tpu.matmul %0, %1, %cst {dimension_numbers = #tpu.dot_dimension_numbers<[1], [0], [0], [1], [0, 0, 1, 1], [], []>} : vector<8x64xf32>, vector<64x512xf32>, vector<8x512xf32> -> vector<8x512xf32>
    %c0_3 = arith.constant 0 : index
    %c0_4 = arith.constant 0 : index
    %3 = vector.load %arg3[%c0_3, %c0_4] : memref<1x512xf32, #tpu.memory_space<vmem>>, vector<1x512xf32>
    %4 = vector.broadcast %3 : vector<1x512xf32> to vector<8x512xf32>
    %5 = arith.addf %2, %4 : vector<8x512xf32>
    %cst_5 = arith.constant 0.000000e+00 : f32
    %6 = vector.broadcast %cst_5 : f32 to vector<8x512xf32>
    %7 = arith.maximumf %5, %6 : vector<8x512xf32>
    %c0_6 = arith.constant 0 : index
    %c0_7 = arith.constant 0 : index
    %8 = vector.load %arg4[%c0_6, %c0_7] : memref<512x256xf32, #tpu.memory_space<vmem>>, vector<512x256xf32>
    %cst_8 = arith.constant dense<0.000000e+00> : vector<8x256xf32>
    %9 = tpu.matmul %7, %8, %cst_8 {dimension_numbers = #tpu.dot_dimension_numbers<[1], [0], [0], [1], [0, 0, 1, 1], [], []>} : vector<8x512xf32>, vector<512x256xf32>, vector<8x256xf32> -> vector<8x256xf32>
    %c0_9 = arith.constant 0 : index
    %c0_10 = arith.constant 0 : index
    %10 = vector.load %arg5[%c0_9, %c0_10] : memref<1x256xf32, #tpu.memory_space<vmem>>, vector<1x256xf32>
    %11 = vector.broadcast %10 : vector<1x256xf32> to vector<8x256xf32>
    %12 = arith.addf %9, %11 : vector<8x256xf32>
    %cst_11 = arith.constant 0.000000e+00 : f32
    %13 = vector.broadcast %cst_11 : f32 to vector<8x256xf32>
    %14 = arith.maximumf %12, %13 : vector<8x256xf32>
    %c0_12 = arith.constant 0 : index
    %c0_13 = arith.constant 0 : index
    %15 = vector.load %arg6[%c0_12, %c0_13] : memref<256x128xf32, #tpu.memory_space<vmem>>, vector<256x128xf32>
    %cst_14 = arith.constant dense<0.000000e+00> : vector<8x128xf32>
    %16 = tpu.matmul %14, %15, %cst_14 {dimension_numbers = #tpu.dot_dimension_numbers<[1], [0], [0], [1], [0, 0, 1, 1], [], []>} : vector<8x256xf32>, vector<256x128xf32>, vector<8x128xf32> -> vector<8x128xf32>
    %c0_15 = arith.constant 0 : index
    %c0_16 = arith.constant 0 : index
    %17 = vector.load %arg7[%c0_15, %c0_16] : memref<1x128xf32, #tpu.memory_space<vmem>>, vector<1x128xf32>
    %18 = vector.broadcast %17 : vector<1x128xf32> to vector<8x128xf32>
    %19 = arith.addf %16, %18 : vector<8x128xf32>
    %c0_17 = arith.constant 0 : index
    %c0_18 = arith.constant 0 : index
    %20 = vector.load %arg8[%c0_17, %c0_18] : memref<8x128xf32, #tpu.memory_space<vmem>>, vector<8x128xf32>
    tpu.vector_store %arg8[%c0_17, %c0_18], %19 {strides = array<i32>} : memref<8x128xf32, #tpu.memory_space<vmem>>, vector<8x128xf32>,
    return
  }
  func.func @transform_0(%arg0: i32) -> (i32, i32) {
    %c0_i32 = arith.constant 0 : i32
    %c0_i32_0 = arith.constant 0 : i32
    return %arg0, %c0_i32 : i32, i32
  }
  func.func @transform_1(%arg0: i32) -> (i32, i32) {
    %c0_i32 = arith.constant 0 : i32
    %c0_i32_0 = arith.constant 0 : i32
    %c0_i32_1 = arith.constant 0 : i32
    return %c0_i32, %c0_i32_0 : i32, i32
  }
  func.func @transform_2(%arg0: i32) -> (i32, i32) {
    %c0_i32 = arith.constant 0 : i32
    %c0_i32_0 = arith.constant 0 : i32
    %c0_i32_1 = arith.constant 0 : i32
    return %c0_i32, %c0_i32_0 : i32, i32
  }
  func.func @transform_3(%arg0: i32) -> (i32, i32) {
    %c0_i32 = arith.constant 0 : i32
    %c0_i32_0 = arith.constant 0 : i32
    %c0_i32_1 = arith.constant 0 : i32
    return %c0_i32, %c0_i32_0 : i32, i32
  }
  func.func @transform_4(%arg0: i32) -> (i32, i32) {
    %c0_i32 = arith.constant 0 : i32
    %c0_i32_0 = arith.constant 0 : i32
    %c0_i32_1 = arith.constant 0 : i32
    return %c0_i32, %c0_i32_0 : i32, i32
  }
  func.func @transform_5(%arg0: i32) -> (i32, i32) {
    %c0_i32 = arith.constant 0 : i32
    %c0_i32_0 = arith.constant 0 : i32
    %c0_i32_1 = arith.constant 0 : i32
    return %c0_i32, %c0_i32_0 : i32, i32
  }
  func.func @transform_6(%arg0: i32) -> (i32, i32) {
    %c0_i32 = arith.constant 0 : i32
    %c0_i32_0 = arith.constant 0 : i32
    %c0_i32_1 = arith.constant 0 : i32
    return %c0_i32, %c0_i32_0 : i32, i32
  }
  func.func @transform_7(%arg0: i32) -> (i32, i32) {
    %c0_i32 = arith.constant 0 : i32
    %c0_i32_0 = arith.constant 0 : i32
    return %arg0, %c0_i32 : i32, i32
  }
}

</mosaic_0001>

<bundles_post_ra>
// kernel: tpu_custom_call.1
= control target key start
LH: loop header
LB: loop body
LE: loop exit
PB: predicated region body
PF: predicated region fallthrough
CT: control target
= control target key end

     0   :  { %12 = vsyncpa [#allocation3], 0  ;;  %s1203_s0 = inlined_call_operand.hbm [shape: f32[8,64], index: 0, kind: input, shape index: {}]   ;;  %s1204_s1 = inlined_call_operand.hbm [shape: f32[64,512], index: 1, kind: input, shape index: {}]   ;;  %s1205_s2 = inlined_call_operand.vmem [shape: f32[1,512], index: 2, kind: input, shape index: {}]   ;;  %s1206_s3 = inlined_call_operand.hbm [shape: f32[512,256], index: 3, kind: input, shape index: {}]   ;;  %s1207_s4 = inlined_call_operand.vmem [shape: f32[1,256], index: 4, kind: input, shape index: {}]   ;;  %s1208_s5 = inlined_call_operand.hbm [shape: f32[256,128], index: 5, kind: input, shape index: {}]   ;;  %s1209_s6 = inlined_call_operand.vmem [shape: f32[1,128], index: 6, kind: input, shape index: {}]   ;;  %s1210_s7 = inlined_call_operand.hbm [shape: f32[8,128], index: 7, kind: output, shape index: {}]  }
   0x1   :  { %13 = vsyncpa [#allocation6], 0 }
   0x2   :  { %14 = vsyncpa [#allocation9], 0 }
   0x3   :  { %15 = vsyncpa [#allocation4], 0  ;;  %s1060_s24 = smov [#allocation5]   ;;  %s942_s28 = scalar_lea.hbm %s1204_s1, 4096 }
   0x4   :  { %s31_s25 = sshll.u32 %s1060_s24, 4  ;;  %p943_p0 = scmp.ne.s32.totalorder %s1204_s1, %s942_s28  ;;  %s32_s25 = int_to_ptr.vmem [resolvable:$true] %s31_s25 }
   0x5   :  { %p946_p1 = scmp.lt.u32.totalorder %s942_s28, %s1204_s1 }
   0x7   :  { %p948_p2 = pnand %p946_p1, %p943_p0 }
   0x9   :  { %951 = shalt.err (!%p948_p2)
}
   0xa   :  { %s952_s10 = scalar_lea.vmem %s32_s25, 4096  ;;  %p957_p4 = scmp.lt.s32.totalorder %s32_s25, %s32_s25 }
   0xb   :  { %p953_p3 = scmp.ne.s32.totalorder %s32_s25, %s952_s10  ;;  %p958_p5 = scmp.lt.s32.totalorder %s952_s10, %s952_s10 }
   0xd   :  { %p959_p6 = por %p958_p5, %p957_p4 }
   0xf   :  { %p960_p7 = pnand %p959_p6, %p953_p3 }
  0x11   :  { %963 = shalt.err (!%p960_p7)
}
  0x12   :  { %s1061_s11 = smov 512   ;;  %s1062_s12 = smov 32  }
  0x13   :  { %37 = dma.hbm_to_vmem [thread:$0]  %s1204_s1, 4096, %s32_s25, [#allocation6], %s1061_s11, %s1061_s11, %s1062_s12  }
  0x14   :  { %s1063_s15 = smov [#allocation2]   ;;  %s1064_s17 = smov [#allocation7]  }
  0x15   :  { %s22_s16 = sshll.u32 %s1063_s15, 4  ;;  %s45_s18 = sshll.u32 %s1064_s17, 4  ;;  %s23_s16 = int_to_ptr.vmem [resolvable:$true] %s22_s16  ;;  %s46_s18 = int_to_ptr.vmem [resolvable:$true] %s45_s18 }
  0x16   :  { %s964_s21 = scalar_lea.hbm %s1203_s0, 128 }
  0x17   :  { %p965_p8 = scmp.ne.s32.totalorder %s1203_s0, %s964_s21  ;;  %p968_p9 = scmp.lt.u32.totalorder %s964_s21, %s1203_s0 }
  0x19   :  { %p970_p10 = pnand %p968_p9, %p965_p8 }
  0x1b   :  { %973 = shalt.err (!%p970_p10)
}
  0x1c   :  { %s974_s1 = scalar_lea.vmem %s23_s16, 128  ;;  %p979_p12 = scmp.lt.s32.totalorder %s23_s16, %s23_s16 }
  0x1d   :  { %p975_p11 = scmp.ne.s32.totalorder %s23_s16, %s974_s1  ;;  %p980_p13 = scmp.lt.s32.totalorder %s974_s1, %s974_s1 }
  0x1f   :  { %p981_p0 = por %p980_p13, %p979_p12 }
  0x21   :  { %p982_p1 = pnand %p981_p0, %p975_p11 }
  0x23   :  { %985 = shalt.err (!%p982_p1)
}
  0x24   :  { %25 = dma.hbm_to_vmem [thread:$0]  %s1203_s0, 128, %s23_s16, [#allocation3]  }
  0x25   :  { %s986_s30 = scalar_lea.hbm %s1206_s3, 16384 }
  0x26   :  { %p987_p2 = scmp.ne.s32.totalorder %s1206_s3, %s986_s30  ;;  %p990_p3 = scmp.lt.u32.totalorder %s986_s30, %s1206_s3 }
  0x28   :  { %p992_p4 = pnand %p990_p3, %p987_p2 }
  0x2a   :  { %995 = shalt.err (!%p992_p4)
}
  0x2b   :  { %s996_s12 = scalar_lea.vmem %s46_s18, 16384  ;;  %p1001_p6 = scmp.lt.s32.totalorder %s46_s18, %s46_s18 }
  0x2c   :  { %p997_p5 = scmp.ne.s32.totalorder %s46_s18, %s996_s12  ;;  %p1002_p7 = scmp.lt.s32.totalorder %s996_s12, %s996_s12 }
  0x2e   :  { %p1003_p8 = por %p1002_p7, %p1001_p6 }
  0x30   :  { %p1004_p9 = pnand %p1003_p8, %p997_p5 }
  0x32   :  { %1007 = shalt.err (!%p1004_p9)
}
  0x33   :  { %s1065_s0 = smov 256   ;;  %s1066_s13 = smov 16  }
  0x34   :  { %51 = dma.hbm_to_vmem [thread:$0]  %s1206_s3, 16384, %s46_s18, [#allocation6], %s1065_s0, %s1065_s0, %s1066_s13  }
  0x35   :  { %s1067_s16 = smov [#allocation8]   ;;  %s1008_s21 = scalar_lea.hbm %s1208_s5, 4096 }
  0x36   :  { %s59_s17 = sshll.u32 %s1067_s16, 4  ;;  %p1009_p10 = scmp.ne.s32.totalorder %s1208_s5, %s1008_s21  ;;  %s60_s17 = int_to_ptr.vmem [resolvable:$true] %s59_s17 }
  0x37   :  { %p1012_p11 = scmp.lt.u32.totalorder %s1008_s21, %s1208_s5 }
  0x39   :  { %p1014_p12 = pnand %p1012_p11, %p1009_p10 }
  0x3b   :  { %1017 = shalt.err (!%p1014_p12)
}
  0x3c   :  { %s1018_s1 = scalar_lea.vmem %s60_s17, 4096  ;;  %p1023_p0 = scmp.lt.s32.totalorder %s60_s17, %s60_s17 }
  0x3d   :  { %p1019_p13 = scmp.ne.s32.totalorder %s60_s17, %s1018_s1  ;;  %p1024_p1 = scmp.lt.s32.totalorder %s1018_s1, %s1018_s1 }
  0x3f   :  { %p1025_p2 = por %p1024_p1, %p1023_p0 }
  0x41   :  { %p1026_p3 = pnand %p1025_p2, %p1019_p13 }
  0x43   :  { %1029 = shalt.err (!%p1026_p3)
}
  0x44   :  { %s1068_s3 = smov 128   ;;  %s1069_s18 = smov 8  }
  0x45   :  { %65 = dma.hbm_to_vmem [thread:$0]  %s1208_s5, 4096, %s60_s17, [#allocation9], %s1068_s3, %s1068_s3, %s1069_s18  }
  0x46   :  { %1052 = dma.done.wait [#allocation3], 128  }
  0x47   :  { %1053 = vsyncadd [#allocation3], 4294967168 }
  0x48   :  { %1054 = dma.done.wait [#allocation6], 20480  }
  0x49   :  { %1055 = vsyncadd [#allocation6], 4294946816 }
  0x4a   :  { %1056 = dma.done.wait [#allocation9], 4096  }
  0x4b   :  { %1057 = vsyncadd [#allocation9], 4294963200  ;;  %v1070_v0 = vmov 0.0   ;;  %v82_v1 = vld [vmem:[#allocation5 + $0x8] sm:$0xff]  ;;  %v81_v3 = vld [vmem:[#allocation5] sm:$0xff]  ;;  %vm135_vm0 = vcmask 523264  }
  0x4c   :  { %203 = vmatprep.mubr.f32.mxu0 %v1070_v0  ;;  %v86_v2 = vld [vmem:[#allocation5 + $0x28] sm:$0xff]  ;;  %v85_v5 = vld [vmem:[#allocation5 + $0x20] sm:$0xff]  ;;  %v84_v24 = vld [vmem:[#allocation5 + $0x18] sm:$0xff] }
  0x4d   :  { %v734_v4 = vpack.c.bf16 %v86_v2, %v82_v1  ;;  %v90_v6 = vld [vmem:[#allocation5 + $0x48] sm:$0xff]  ;;  %v736_v8 = vpack.c.bf16 %v85_v5, %v81_v3  ;;  %v89_v10 = vld [vmem:[#allocation5 + $0x40] sm:$0xff]  ;;  %v88_v25 = vld [vmem:[#allocation5 + $0x38] sm:$0xff] }
  0x4e   :  { %v94_v7 = vld [vmem:[#allocation5 + $0x68] sm:$0xff]  ;;  %v93_v11 = vld [vmem:[#allocation5 + $0x60] sm:$0xff]  ;;  %v83_v26 = vld [vmem:[#allocation5 + $0x10] sm:$0xff]  ;;  %v750_v36 = vpack.c.bf16 %v88_v25, %v84_v24 }
  0x4f   :  { %v738_v9 = vpack.c.bf16 %v94_v7, %v90_v6  ;;  %v98_v12 = vld [vmem:[#allocation5 + $0x88] sm:$0xff]  ;;  %735 = vmatprep.subr.bf16.mxu0 %v734_v4  ;;  %v740_v14 = vpack.c.bf16 %v93_v11, %v89_v10  ;;  %v97_v16 = vld [vmem:[#allocation5 + $0x80] sm:$0xff]  ;;  %v87_v27 = vld [vmem:[#allocation5 + $0x30] sm:$0xff] }
  0x50   :  { %v102_v13 = vld [vmem:[#allocation5 + $0xa8] sm:$0xff]  ;;  %737 = vmatpush1.bf16.msra.mxu0 %v736_v8  ;;  %v101_v17 = vld [vmem:[#allocation5 + $0xa0] sm:$0xff]  ;;  %v288_v29 = vld [vmem:[#allocation7 + $0x18] sm:$0xff]  ;;  %v752_v47 = vpack.c.bf16 %v87_v27, %v83_v26 }
  0x51   :  { %739 = vmatprep.subr.bf16.mxu0 %v738_v9  ;;  %v742_v15 = vpack.c.bf16 %v102_v13, %v98_v12  ;;  %v106_v18 = vld [vmem:[#allocation5 + $0xc8] sm:$0xff]  ;;  %v744_v20 = vpack.c.bf16 %v101_v17, %v97_v16  ;;  %v105_v22 = vld [vmem:[#allocation5 + $0xc0] sm:$0xff]  ;;  %v287_v33 = vld [vmem:[#allocation7 + $0x10] sm:$0xff] }
  0x52   :  { %v110_v19 = vld [vmem:[#allocation5 + $0xe8] sm:$0xff]  ;;  %v109_v23 = vld [vmem:[#allocation5 + $0xe0] sm:$0xff]  ;;  %v292_v35 = vld [vmem:[#allocation7 + $0x38] sm:$0xff] }
  0x53   :  { %v746_v21 = vpack.c.bf16 %v110_v19, %v106_v18  ;;  %v286_v28 = vld [vmem:[#allocation7 + $0x8] sm:$0xff]  ;;  %v285_v30 = vld [vmem:[#allocation7] sm:$0xff]  ;;  %v748_v31 = vpack.c.bf16 %v109_v23, %v105_v22  ;;  %v92_v37 = vld [vmem:[#allocation5 + $0x58] sm:$0xff] }
  0x54   :  { %741 = vmatpush1.bf16.msra.mxu0 %v740_v14  ;;  %v766_v32 = vpack.c.bf16 %v288_v29, %v286_v28  ;;  %v290_v34 = vld [vmem:[#allocation7 + $0x28] sm:$0xff]  ;;  %v768_v38 = vpack.c.bf16 %v287_v33, %v285_v30  ;;  %v289_v40 = vld [vmem:[#allocation7 + $0x20] sm:$0xff]  ;;  %v291_v41 = vld [vmem:[#allocation7 + $0x30] sm:$0xff] }
  0x55   :  { %743 = vmatprep.subr.bf16.mxu0 %v742_v15  ;;  %v770_v39 = vpack.c.bf16 %v292_v35, %v290_v34  ;;  %v96_v42 = vld [vmem:[#allocation5 + $0x78] sm:$0xff]  ;;  %v294_v43 = vld [vmem:[#allocation7 + $0x48] sm:$0xff]  ;;  %v772_v46 = vpack.c.bf16 %v291_v41, %v289_v40  ;;  %v91_v48 = vld [vmem:[#allocation5 + $0x50] sm:$0xff] }
  0x56   :  { %767 = vmatprep.subr.bf16.mxu1 %v766_v32  ;;  %v296_v44 = vld [vmem:[#allocation7 + $0x58] sm:$0xff]  ;;  %v293_v49 = vld [vmem:[#allocation7 + $0x40] sm:$0xff]  ;;  %v295_v50 = vld [vmem:[#allocation7 + $0x50] sm:$0xff]  ;;  %v754_v51 = vpack.c.bf16 %v96_v42, %v92_v37 }
  0x57   :  { %v1161_v45 = vld [vmem:[#allocation2] sm:$0xff]  ;;  %769 = vmatpush1.bf16.msra.mxu1 %v768_v38  ;;  %v95_v52 = vld [vmem:[#allocation5 + $0x70] sm:$0xff]  ;;  %v774_v53 = vpack.c.bf16 %v296_v44, %v294_v43  ;;  %v298_v54 = vld [vmem:[#allocation7 + $0x68] sm:$0xff]  ;;  %v776_v58 = vpack.c.bf16 %v295_v50, %v293_v49 }
  0x58   :  { %745 = vmatpush1.bf16.msra.mxu0 %v744_v20  ;;  %771 = vmatprep.subr.bf16.mxu1 %v770_v39  ;;  %v300_v55 = vld [vmem:[#allocation7 + $0x78] sm:$0xff]  ;;  %v756_v59 = vpack.c.bf16 %v95_v52, %v91_v48  ;;  %v99_v60 = vld [vmem:[#allocation5 + $0x90] sm:$0xff]  ;;  %v297_v62 = vld [vmem:[#allocation7 + $0x60] sm:$0xff] }
  0x59   :  { %747 = vmatprep.subr.bf16.mxu0 %v746_v21  ;;  %v100_v56 = vld [vmem:[#allocation5 + $0x98] sm:$0xff]  ;;  %v778_v61 = vpack.c.bf16 %v300_v55, %v298_v54  ;;  %v299_v63 = vld [vmem:[#allocation7 + $0x70] sm:$0xff]  ;;  %v302_v3 = vld [vmem:[#allocation7 + $0x88] sm:$0xff] }
  0x5a   :  { %v104_v57 = vld [vmem:[#allocation5 + $0xb8] sm:$0xff]  ;;  %v103_v2 = vld [vmem:[#allocation5 + $0xb0] sm:$0xff]  ;;  %v780_v7 = vpack.c.bf16 %v299_v63, %v297_v62  ;;  %v301_v11 = vld [vmem:[#allocation7 + $0x80] sm:$0xff] }
  0x5b   :  { %773 = vmatpush1.bf16.msra.mxu1 %v772_v46  ;;  %v758_v1 = vpack.c.bf16 %v104_v57, %v100_v56  ;;  %v304_v4 = vld [vmem:[#allocation7 + $0x98] sm:$0xff]  ;;  %v760_v8 = vpack.c.bf16 %v103_v2, %v99_v60  ;;  %v107_v9 = vld [vmem:[#allocation5 + $0xd0] sm:$0xff]  ;;  %v306_v14 = vld [vmem:[#allocation7 + $0xa8] sm:$0xff] }
  0x5c   :  { %749 = vmatpush1.bf16.msra.mxu0 %v748_v31  ;;  %775 = vmatprep.subr.bf16.mxu1 %v774_v53  ;;  %v108_v5 = vld [vmem:[#allocation5 + $0xd8] sm:$0xff]  ;;  %v782_v10 = vpack.c.bf16 %v304_v4, %v302_v3  ;;  %v111_v13 = vld [vmem:[#allocation5 + $0xf0] sm:$0xff]  ;;  %v350_v16 = vld [vmem:[#allocation7 + $0x208] sm:$0xff] }
  0x5d   :  { %751 = vmatprep.subr.bf16.mxu0 %v750_v36  ;;  %v112_v6 = vld [vmem:[#allocation5 + $0xf8] sm:$0xff]  ;;  %v764_v19 = vpack.c.bf16 %v111_v13, %v107_v9  ;;  %v349_v20 = vld [vmem:[#allocation7 + $0x200] sm:$0xff]  ;;  %v307_v23 = vld [vmem:[#allocation7 + $0xb0] sm:$0xff] }
  0x5e   :  { %v762_v12 = vpack.c.bf16 %v112_v6, %v108_v5  ;;  %v308_v15 = vld [vmem:[#allocation7 + $0xb8] sm:$0xff]  ;;  %v305_v22 = vld [vmem:[#allocation7 + $0xa0] sm:$0xff]  ;;  %v351_v25 = vld [vmem:[#allocation7 + $0x210] sm:$0xff] }
  0x5f   :  { %696 = vmatmul.mubr.msk.f32.vlgmr.msra.gmra.mrb[0].mxu0 %vm135_vm0, %v1161_v45  ;;  %777 = vmatpush1.bf16.msra.mxu1 %v776_v58  ;;  %v352_v17 = vld [vmem:[#allocation7 + $0x218] sm:$0xff]  ;;  %v786_v21 = vpack.c.bf16 %v308_v15, %v306_v14  ;;  %v310_v26 = vld [vmem:[#allocation7 + $0xc8] sm:$0xff]  ;;  %v788_v30 = vpack.c.bf16 %v307_v23, %v305_v22  ;;  %v832_v31 = vpack.c.bf16 %v351_v25, %v349_v20  ;;  %v353_v32 = vld [vmem:[#allocation7 + $0x220] sm:$0xff] }
  0x60   :  { %753 = vmatpush1.bf16.msra.mxu0 %v752_v47  ;;  %274 = vmatprep.mubr.f32.mxu0 %v1070_v0  ;;  %v303_v0 = vld [vmem:[#allocation7 + $0x90] sm:$0xff]  ;;  %v830_v24 = vpack.c.bf16 %v352_v17, %v350_v16  ;;  %v312_v27 = vld [vmem:[#allocation7 + $0xd8] sm:$0xff]  ;;  %v354_v28 = vld [vmem:[#allocation7 + $0x228] sm:$0xff] }
  0x61   :  { %755 = vmatprep.subr.bf16.mxu0 %v754_v51  ;;  %779 = vmatprep.subr.bf16.mxu1 %v778_v61  ;;  %v784_v18 = vpack.c.bf16 %v303_v0, %v301_v11  ;;  %v356_v29 = vld [vmem:[#allocation7 + $0x238] sm:$0xff]  ;;  %v790_v33 = vpack.c.bf16 %v312_v27, %v310_v26  ;;  %v309_v34 = vld [vmem:[#allocation7 + $0xc0] sm:$0xff]  ;;  %v311_v35 = vld [vmem:[#allocation7 + $0xd0] sm:$0xff] }
  0x62   :  { %v834_v36 = vpack.c.bf16 %v356_v29, %v354_v28  ;;  %v355_v37 = vld [vmem:[#allocation7 + $0x230] sm:$0xff]  ;;  %v314_v38 = vld [vmem:[#allocation7 + $0xe8] sm:$0xff]  ;;  %v316_v39 = vld [vmem:[#allocation7 + $0xf8] sm:$0xff]  ;;  %v792_v42 = vpack.c.bf16 %v311_v35, %v309_v34 }
  0x63   :  { %781 = vmatpush1.bf16.msra.mxu1 %v780_v7  ;;  %v358_v40 = vld [vmem:[#allocation7 + $0x248] sm:$0xff]  ;;  %v360_v41 = vld [vmem:[#allocation7 + $0x258] sm:$0xff]  ;;  %v836_v43 = vpack.c.bf16 %v355_v37, %v353_v32  ;;  %v357_v44 = vld [vmem:[#allocation7 + $0x240] sm:$0xff]  ;;  %v794_v46 = vpack.c.bf16 %v316_v39, %v314_v38 }
  0x64   :  { %757 = vmatpush1.bf16.msra.mxu0 %v756_v59  ;;  %783 = vmatprep.subr.bf16.mxu1 %v782_v10  ;;  %v313_v47 = vld [vmem:[#allocation7 + $0xe0] sm:$0xff]  ;;  %v315_v48 = vld [vmem:[#allocation7 + $0xf0] sm:$0xff]  ;;  %v838_v49 = vpack.c.bf16 %v360_v41, %v358_v40  ;;  %v318_v51 = vld [vmem:[#allocation7 + $0x108] sm:$0xff] }
  0x65   :  { %759 = vmatprep.subr.bf16.mxu0 %v758_v1  ;;  %v359_v50 = vld [vmem:[#allocation7 + $0x250] sm:$0xff]  ;;  %v320_v52 = vld [vmem:[#allocation7 + $0x118] sm:$0xff]  ;;  %v362_v53 = vld [vmem:[#allocation7 + $0x268] sm:$0xff]  ;;  %v796_v55 = vpack.c.bf16 %v315_v48, %v313_v47 }
  0x66   :  { %v364_v54 = vld [vmem:[#allocation7 + $0x278] sm:$0xff]  ;;  %v361_v56 = vld [vmem:[#allocation7 + $0x260] sm:$0xff]  ;;  %v798_v57 = vpack.c.bf16 %v320_v52, %v318_v51  ;;  %v319_v59 = vld [vmem:[#allocation7 + $0x110] sm:$0xff] }
  0x67   :  { %785 = vmatpush1.bf16.msra.mxu1 %v784_v18  ;;  %v317_v58 = vld [vmem:[#allocation7 + $0x100] sm:$0xff]  ;;  %v842_v60 = vpack.c.bf16 %v364_v54, %v362_v53  ;;  %v363_v61 = vld [vmem:[#allocation7 + $0x270] sm:$0xff]  ;;  %v322_v62 = vld [vmem:[#allocation7 + $0x128] sm:$0xff] }
  0x68   :  { %761 = vmatpush1.bf16.msra.mxu0 %v760_v8  ;;  %787 = vmatprep.subr.bf16.mxu1 %v786_v21  ;;  %v324_v63 = vld [vmem:[#allocation7 + $0x138] sm:$0xff]  ;;  %v366_v1 = vld [vmem:[#allocation7 + $0x288] sm:$0xff]  ;;  %v800_v3 = vpack.c.bf16 %v319_v59, %v317_v58  ;;  %v844_v4 = vpack.c.bf16 %v363_v61, %v361_v56  ;;  %v365_v5 = vld [vmem:[#allocation7 + $0x280] sm:$0xff] }
  0x69   :  { %763 = vmatprep.subr.bf16.mxu0 %v762_v12  ;;  %v368_v2 = vld [vmem:[#allocation7 + $0x298] sm:$0xff]  ;;  %v802_v6 = vpack.c.bf16 %v324_v63, %v322_v62  ;;  %v321_v7 = vld [vmem:[#allocation7 + $0x120] sm:$0xff]  ;;  %v323_v8 = vld [vmem:[#allocation7 + $0x130] sm:$0xff] }
  0x6a   :  { %v846_v9 = vpack.c.bf16 %v368_v2, %v366_v1  ;;  %v367_v10 = vld [vmem:[#allocation7 + $0x290] sm:$0xff]  ;;  %v326_v11 = vld [vmem:[#allocation7 + $0x148] sm:$0xff]  ;;  %v328_v0 = vld [vmem:[#allocation7 + $0x158] sm:$0xff]  ;;  %v804_v14 = vpack.c.bf16 %v323_v8, %v321_v7 }
  0x6b   :  { %789 = vmatpush1.bf16.msra.mxu1 %v788_v30  ;;  %v370_v12 = vld [vmem:[#allocation7 + $0x2a8] sm:$0xff]  ;;  %v372_v13 = vld [vmem:[#allocation7 + $0x2b8] sm:$0xff]  ;;  %v848_v15 = vpack.c.bf16 %v367_v10, %v365_v5  ;;  %v369_v16 = vld [vmem:[#allocation7 + $0x2a0] sm:$0xff]  ;;  %v806_v17 = vpack.c.bf16 %v328_v0, %v326_v11 }
  0x6c   :  { %765 = vmatpush1.bf16.msra.mxu0 %v764_v19  ;;  %791 = vmatprep.subr.bf16.mxu1 %v790_v33  ;;  %v325_v18 = vld [vmem:[#allocation7 + $0x140] sm:$0xff]  ;;  %v327_v19 = vld [vmem:[#allocation7 + $0x150] sm:$0xff]  ;;  %v850_v20 = vpack.c.bf16 %v372_v13, %v370_v12  ;;  %v330_v22 = vld [vmem:[#allocation7 + $0x168] sm:$0xff] }
  0x6d   :  { %831 = vmatprep.subr.bf16.mxu0 %v830_v24  ;;  %v371_v21 = vld [vmem:[#allocation7 + $0x2b0] sm:$0xff]  ;;  %v332_v23 = vld [vmem:[#allocation7 + $0x178] sm:$0xff]  ;;  %v374_v24 = vld [vmem:[#allocation7 + $0x2c8] sm:$0xff]  ;;  %v808_v26 = vpack.c.bf16 %v327_v19, %v325_v18 }
  0x6e   :  { %v376_v25 = vld [vmem:[#allocation7 + $0x2d8] sm:$0xff]  ;;  %v852_v27 = vpack.c.bf16 %v371_v21, %v369_v16  ;;  %v373_v28 = vld [vmem:[#allocation7 + $0x2c0] sm:$0xff]  ;;  %v810_v29 = vpack.c.bf16 %v332_v23, %v330_v22  ;;  %v375_v33 = vld [vmem:[#allocation7 + $0x2d0] sm:$0xff] }
  0x6f   :  { %697 = vmatmul.mubr.msk.f32.vlgmr.msra.gmra.mrb[2].mxu0 %vm135_vm0, %v1161_v45  ;;  %793 = vmatpush1.bf16.msra.mxu1 %v792_v42  ;;  %v840_v45 = vpack.c.bf16 %v359_v50, %v357_v44  ;;  %v329_v30 = vld [vmem:[#allocation7 + $0x160] sm:$0xff]  ;;  %v854_v32 = vpack.c.bf16 %v376_v25, %v374_v24  ;;  %v334_v34 = vld [vmem:[#allocation7 + $0x188] sm:$0xff]  ;;  %v336_v35 = vld [vmem:[#allocation7 + $0x198] sm:$0xff]  ;;  %v856_v39 = vpack.c.bf16 %v375_v33, %v373_v28 }
  0x70   :  { %833 = vmatpush1.bf16.msra.mxu0 %v832_v31  ;;  %795 = vmatprep.subr.bf16.mxu1 %v794_v46  ;;  %v331_v31 = vld [vmem:[#allocation7 + $0x170] sm:$0xff]  ;;  %v380_v37 = vld [vmem:[#allocation7 + $0x2f8] sm:$0xff]  ;;  %v377_v40 = vld [vmem:[#allocation7 + $0x2e0] sm:$0xff]  ;;  %v814_v41 = vpack.c.bf16 %v336_v35, %v334_v34 }
  0x71   :  { %835 = vmatprep.subr.bf16.mxu0 %v834_v36  ;;  %v378_v36 = vld [vmem:[#allocation7 + $0x2e8] sm:$0xff]  ;;  %v812_v38 = vpack.c.bf16 %v331_v31, %v329_v30  ;;  %v333_v42 = vld [vmem:[#allocation7 + $0x180] sm:$0xff]  ;;  %v379_v46 = vld [vmem:[#allocation7 + $0x2f0] sm:$0xff] }
  0x72   :  { %v858_v44 = vpack.c.bf16 %v380_v37, %v378_v36  ;;  %v338_v47 = vld [vmem:[#allocation7 + $0x1a8] sm:$0xff]  ;;  %v340_v48 = vld [vmem:[#allocation7 + $0x1b8] sm:$0xff]  ;;  %v860_v52 = vpack.c.bf16 %v379_v46, %v377_v40  ;;  %v381_v53 = vld [vmem:[#allocation7 + $0x300] sm:$0xff] }
  0x73   :  { %797 = vmatpush1.bf16.msra.mxu1 %v796_v55  ;;  %v384_v50 = vld [vmem:[#allocation7 + $0x318] sm:$0xff]  ;;  %v818_v54 = vpack.c.bf16 %v340_v48, %v338_v47  ;;  %v337_v55 = vld [vmem:[#allocation7 + $0x1a0] sm:$0xff]  ;;  %v342_v58 = vld [vmem:[#allocation7 + $0x1c8] sm:$0xff] }
  0x74   :  { %837 = vmatpush1.bf16.msra.mxu0 %v836_v43  ;;  %799 = vmatprep.subr.bf16.mxu1 %v798_v57  ;;  %v335_v43 = vld [vmem:[#allocation7 + $0x190] sm:$0xff]  ;;  %v344_v59 = vld [vmem:[#allocation7 + $0x1d8] sm:$0xff]  ;;  %v390_v5 = vld [vmem:[#allocation7 + $0x348] sm:$0xff] }
  0x75   :  { %839 = vmatprep.subr.bf16.mxu0 %v838_v49  ;;  %v382_v49 = vld [vmem:[#allocation7 + $0x308] sm:$0xff]  ;;  %v816_v51 = vpack.c.bf16 %v335_v43, %v333_v42  ;;  %v383_v57 = vld [vmem:[#allocation7 + $0x310] sm:$0xff]  ;;  %v388_v61 = vld [vmem:[#allocation7 + $0x338] sm:$0xff]  ;;  %v822_v1 = vpack.c.bf16 %v344_v59, %v342_v58 }
  0x76   :  { %v862_v56 = vpack.c.bf16 %v384_v50, %v382_v49  ;;  %v864_v63 = vpack.c.bf16 %v383_v57, %v381_v53  ;;  %v343_v10 = vld [vmem:[#allocation7 + $0x1d0] sm:$0xff]  ;;  %v389_v11 = vld [vmem:[#allocation7 + $0x340] sm:$0xff]  ;;  %v394_v16 = vld [vmem:[#allocation7 + $0x368] sm:$0xff] }
  0x77   :  { %801 = vmatpush1.bf16.msra.mxu1 %v800_v3  ;;  %v385_v3 = vld [vmem:[#allocation7 + $0x320] sm:$0xff]  ;;  %v391_v12 = vld [vmem:[#allocation7 + $0x350] sm:$0xff]  ;;  %v396_v18 = vld [vmem:[#allocation7 + $0x378] sm:$0xff] }
  0x78   :  { %841 = vmatpush1.bf16.msra.mxu0 %v840_v45  ;;  %803 = vmatprep.subr.bf16.mxu1 %v802_v6  ;;  %v339_v45 = vld [vmem:[#allocation7 + $0x1b0] sm:$0xff]  ;;  %v392_v6 = vld [vmem:[#allocation7 + $0x358] sm:$0xff]  ;;  %v872_v13 = vpack.c.bf16 %v391_v12, %v389_v11  ;;  %v345_v19 = vld [vmem:[#allocation7 + $0x1e0] sm:$0xff]  ;;  %v874_v21 = vpack.c.bf16 %v396_v18, %v394_v16 }
  0x79   :  { %843 = vmatprep.subr.bf16.mxu0 %v842_v60  ;;  %v386_v60 = vld [vmem:[#allocation7 + $0x328] sm:$0xff]  ;;  %v820_v62 = vpack.c.bf16 %v339_v45, %v337_v55  ;;  %v870_v8 = vpack.c.bf16 %v392_v6, %v390_v5  ;;  %v393_v23 = vld [vmem:[#allocation7 + $0x360] sm:$0xff]  ;;  %v395_v24 = vld [vmem:[#allocation7 + $0x370] sm:$0xff] }
  0x7a   :  { %v866_v2 = vpack.c.bf16 %v388_v61, %v386_v60  ;;  %v876_v25 = vpack.c.bf16 %v395_v24, %v393_v23  ;;  %v399_v30 = vld [vmem:[#allocation7 + $0x390] sm:$0xff]  ;;  %v404_v33 = vld [vmem:[#allocation7 + $0x3b8] sm:$0xff]  ;;  %v401_v34 = vld [vmem:[#allocation7 + $0x3a0] sm:$0xff] }
  0x7b   :  { %805 = vmatpush1.bf16.msra.mxu1 %v804_v14  ;;  %v346_v14 = vld [vmem:[#allocation7 + $0x1e8] sm:$0xff]  ;;  %v403_v36 = vld [vmem:[#allocation7 + $0x3b0] sm:$0xff]  ;;  %v412_v46 = vld [vmem:[#allocation7 + $0x3f8] sm:$0xff] }
  0x7c   :  { %845 = vmatpush1.bf16.msra.mxu0 %v844_v4  ;;  %807 = vmatprep.subr.bf16.mxu1 %v806_v17  ;;  %v387_v4 = vld [vmem:[#allocation7 + $0x330] sm:$0xff]  ;;  %v406_v37 = vld [vmem:[#allocation7 + $0x3c8] sm:$0xff]  ;;  %v409_v48 = vld [vmem:[#allocation7 + $0x3e0] sm:$0xff] }
  0x7d   :  { %847 = vmatprep.subr.bf16.mxu0 %v846_v9  ;;  %v868_v7 = vpack.c.bf16 %v387_v4, %v385_v3  ;;  %v341_v9 = vld [vmem:[#allocation7 + $0x1c0] sm:$0xff]  ;;  %v407_v42 = vld [vmem:[#allocation7 + $0x3d0] sm:$0xff]  ;;  %v588_v4 = vld [vmem:[#allocation8 + $0x98] sm:$0xff] }
  0x7e   :  { %v824_v0 = vpack.c.bf16 %v343_v10, %v341_v9  ;;  %v411_v49 = vld [vmem:[#allocation7 + $0x3f0] sm:$0xff]  ;;  %v572_v10 = vld [vmem:[#allocation8 + $0x18] sm:$0xff]  ;;  %v589_v11 = vld [vmem:[#allocation8 + $0xa0] sm:$0xff] }
  0x7f   :  { %809 = vmatpush1.bf16.msra.mxu1 %v808_v26  ;;  %v398_v26 = vld [vmem:[#allocation7 + $0x388] sm:$0xff]  ;;  %v892_v50 = vpack.c.bf16 %v411_v49, %v409_v48  ;;  %v587_v3 = vld [vmem:[#allocation8 + $0x90] sm:$0xff]  ;;  %v573_v24 = vld [vmem:[#allocation8 + $0x20] sm:$0xff] }
  0x80   :  { %849 = vmatpush1.bf16.msra.mxu0 %v848_v15  ;;  %811 = vmatprep.subr.bf16.mxu1 %v810_v29  ;;  %v348_v15 = vld [vmem:[#allocation7 + $0x1f8] sm:$0xff]  ;;  %v397_v29 = vld [vmem:[#allocation7 + $0x380] sm:$0xff]  ;;  %v571_v9 = vld [vmem:[#allocation8 + $0x10] sm:$0xff] }
  0x81   :  { %851 = vmatprep.subr.bf16.mxu0 %v850_v20  ;;  %v826_v17 = vpack.c.bf16 %v348_v15, %v346_v14  ;;  %v347_v20 = vld [vmem:[#allocation7 + $0x1f0] sm:$0xff]  ;;  %v880_v31 = vpack.c.bf16 %v399_v30, %v397_v29  ;;  %v900_v12 = vpack.c.bf16 %v572_v10, %v571_v9  ;;  %v581_v49 = vld [vmem:[#allocation8 + $0x60] sm:$0xff] }
  0x82   :  { %v828_v22 = vpack.c.bf16 %v347_v20, %v345_v19  ;;  %v575_v30 = vld [vmem:[#allocation8 + $0x30] sm:$0xff] }
  0x83   :  { %813 = vmatpush1.bf16.msra.mxu1 %v812_v38  ;;  %v408_v38 = vld [vmem:[#allocation7 + $0x3d8] sm:$0xff] }
  0x84   :  { %853 = vmatpush1.bf16.msra.mxu0 %v852_v27  ;;  %815 = vmatprep.subr.bf16.mxu1 %v814_v41  ;;  %v400_v27 = vld [vmem:[#allocation7 + $0x398] sm:$0xff]  ;;  %v886_v40 = vpack.c.bf16 %v408_v38, %v406_v37  ;;  %v405_v41 = vld [vmem:[#allocation7 + $0x3c0] sm:$0xff]  ;;  %v578_v37 = vld [vmem:[#allocation8 + $0x48] sm:$0xff] }
  0x85   :  { %855 = vmatprep.subr.bf16.mxu0 %v854_v32  ;;  %v878_v28 = vpack.c.bf16 %v400_v27, %v398_v26  ;;  %v402_v32 = vld [vmem:[#allocation7 + $0x3a8] sm:$0xff]  ;;  %v888_v43 = vpack.c.bf16 %v407_v42, %v405_v41  ;;  %v591_v27 = vld [vmem:[#allocation8 + $0xb0] sm:$0xff] }
  0x86   :  { %v882_v35 = vpack.c.bf16 %v404_v33, %v402_v32  ;;  %v593_v33 = vld [vmem:[#allocation8 + $0xc0] sm:$0xff]  ;;  %v595_v38 = vld [vmem:[#allocation8 + $0xd0] sm:$0xff] }
  0x87   :  { %817 = vmatpush1.bf16.msra.mxu1 %v816_v51  ;;  %v585_v51 = vld [vmem:[#allocation8 + $0x80] sm:$0xff]  ;;  %v579_v42 = vld [vmem:[#allocation8 + $0x50] sm:$0xff] }
  0x88   :  { %857 = vmatpush1.bf16.msra.mxu0 %v856_v39  ;;  %819 = vmatprep.subr.bf16.mxu1 %v818_v54  ;;  %v884_v39 = vpack.c.bf16 %v403_v36, %v401_v34  ;;  %v115_v54 = vlaneseq  ;;  %v594_v34 = vld [vmem:[#allocation8 + $0xc8] sm:$0xff] }
  0x89   :  { %859 = vmatprep.subr.bf16.mxu0 %v858_v44  ;;  %v410_v44 = vld [vmem:[#allocation7 + $0x3e8] sm:$0xff]  ;;  %v910_v36 = vpack.c.bf16 %v594_v34, %v593_v33 }
  0x8a   :  { %v890_v47 = vpack.c.bf16 %v412_v46, %v410_v44  ;;  %v1168_v55 = vshrl.u32 %v115_v54, 7  ;;  %v597_v44 = vld [vmem:[#allocation8 + $0xe0] sm:$0xff]  ;;  %v598_v46 = vld [vmem:[#allocation8 + $0xe8] sm:$0xff] }
  0x8b   :  { %821 = vmatpush1.bf16.msra.mxu1 %v820_v62  ;;  %v918_v48 = vpack.c.bf16 %v598_v46, %v597_v44 }
  0x8c   :  { %861 = vmatpush1.bf16.msra.mxu0 %v860_v52  ;;  %823 = vmatprep.subr.bf16.mxu1 %v822_v1  ;;  %v586_v52 = vld [vmem:[#allocation8 + $0x88] sm:$0xff]  ;;  %v117_v45 = vsub.s32 0, %v1168_v55  ;;  %v121_v57 = vsub.s32 1, %v1168_v55  ;;  %v129_v15 = vsub.s32 3, %v1168_v55 }
  0x8d   :  { %863 = vmatprep.subr.bf16.mxu0 %v862_v56  ;;  %v894_v53 = vpack.c.bf16 %v586_v52, %v585_v51  ;;  %v113_v56 = vld [vmem:[%s1205_s2] sm:$0xf]  ;;  %v570_v1 = vld [vmem:[#allocation8 + $0x8] sm:$0xff]  ;;  %v599_v52 = vld [vmem:[#allocation8 + $0xf0] sm:$0xff] }
  0x8e   :  { %v118_v58 = vrot.slane %v113_v56, %v117_v45  ;;  %v122_v59 = vrot.slane %v113_v56, %v121_v57 }
  0x8f   :  { %825 = vmatpush1.bf16.msra.mxu1 %v824_v0  ;;  %v590_v0 = vld [vmem:[#allocation8 + $0xa8] sm:$0xff] }
  0x90   :  { %865 = vmatpush1.bf16.msra.mxu0 %v864_v63  ;;  %827 = vmatprep.subr.bf16.mxu1 %v826_v17  ;;  %v569_v63 = vld [vmem:[#allocation8] sm:$0xff]  ;;  %v902_v14 = vpack.c.bf16 %v590_v0, %v589_v11  ;;  %v130_v17 = vrot.slane %v113_v56, %v129_v15  ;;  %v698_v11 = vld [vmem:[%s1209_s6] ss:$0 sm:$0xff] }
  0x91   :  { %867 = vmatprep.subr.bf16.mxu0 %v866_v2 }
  0x93   :  { %829 = vmatpush1.bf16.msra.mxu1 %v828_v22 }
  0x94   :  { %869 = vmatpush1.bf16.msra.mxu0 %v868_v7  ;;  %895 = vmatprep.subr.bf16.mxu1 %v894_v53  ;;  %v896_v7 = vpack.c.bf16 %v570_v1, %v569_v63  ;;  %v600_v53 = vld [vmem:[#allocation8 + $0xf8] sm:$0xff] }
  0x95   :  { %871 = vmatprep.subr.bf16.mxu0 %v870_v8  ;;  %v898_v8 = vpack.c.bf16 %v588_v4, %v587_v3  ;;  %v922_v54 = vpack.c.bf16 %v600_v53, %v599_v52 }
  0x98   :  { %873 = vmatpush1.bf16.msra.mxu0 %v872_v13  ;;  %v125_v13 = vsub.s32 2, %v1168_v55 }
  0x99   :  { %875 = vmatprep.subr.bf16.mxu0 %v874_v21 }
  0x9a   :  { %v126_v16 = vrot.slane %v113_v56, %v125_v13  ;;  %v583_v56 = vld [vmem:[#allocation8 + $0x70] sm:$0xff] }
  0x9c   :  { %877 = vmatpush1.bf16.msra.mxu0 %v876_v25  ;;  %v574_v25 = vld [vmem:[#allocation8 + $0x28] sm:$0xff] }
  0x9d   :  { %879 = vmatprep.subr.bf16.mxu0 %v878_v28  ;;  %v904_v26 = vpack.c.bf16 %v574_v25, %v573_v24  ;;  %v592_v28 = vld [vmem:[#allocation8 + $0xb8] sm:$0xff] }
  0x9e   :  { %v906_v29 = vpack.c.bf16 %v592_v28, %v591_v27 }
  0xa0   :  { %881 = vmatpush1.bf16.msra.mxu0 %v880_v31  ;;  %v576_v31 = vld [vmem:[#allocation8 + $0x38] sm:$0xff] }
  0xa1   :  { %883 = vmatprep.subr.bf16.mxu0 %v882_v35  ;;  %v908_v32 = vpack.c.bf16 %v576_v31, %v575_v30  ;;  %v577_v35 = vld [vmem:[#allocation8 + $0x40] sm:$0xff] }
  0xa4   :  { %885 = vmatpush1.bf16.msra.mxu0 %v884_v39  ;;  %v596_v39 = vld [vmem:[#allocation8 + $0xd8] sm:$0xff] }
  0xa5   :  { %887 = vmatprep.subr.bf16.mxu0 %v886_v40  ;;  %v912_v40 = vpack.c.bf16 %v578_v37, %v577_v35  ;;  %v914_v41 = vpack.c.bf16 %v596_v39, %v595_v38 }
  0xa8   :  { %889 = vmatpush1.bf16.msra.mxu0 %v888_v43  ;;  %v580_v43 = vld [vmem:[#allocation8 + $0x58] sm:$0xff] }
  0xa9   :  { %891 = vmatprep.subr.bf16.mxu0 %v890_v47  ;;  %v916_v47 = vpack.c.bf16 %v580_v43, %v579_v42 }
  0xac   :  { %893 = vmatpush1.bf16.msra.mxu0 %v892_v50  ;;  %v582_v50 = vld [vmem:[#allocation8 + $0x68] sm:$0xff] }
  0xad   :  { %v920_v51 = vpack.c.bf16 %v582_v50, %v581_v49 }
 0x132   :  { %v205_v60 = vpop.f32.mrb[0].mxu0 }
 0x133   :  { %v206_v61 = vadd.f32 %v205_v60, %v118_v58  ;;  %v207_v62 = vpop.f32.mrb[1].mxu0  ;;  %v584_v58 = vld [vmem:[#allocation8 + $0x78] sm:$0xff] }
 0x134   :  { %v208_v2 = vadd.f32 %v207_v62, %v122_v59  ;;  %v924_v59 = vpack.c.bf16 %v584_v58, %v583_v56  ;;  %v413_v62 = vld [vmem:[%s1207_s4] sm:$0x3]  ;;  %s1071_s4 = smov [#allocation10]  }
 0x135   :  { %v281_v5 = vmax.f32 %v206_v61, 0.0  ;;  %v418_v63 = vrot.slane %v413_v62, %v117_v45  ;;  %v422_v1 = vrot.slane %v413_v62, %v121_v57  ;;  %s685_s9 = sshll.u32 %s1071_s4, 4  ;;  %s686_s9 = int_to_ptr.vmem [resolvable:$true] %s685_s9 }
 0x136   :  { %v282_v6 = vmax.f32 %v208_v2, 0.0  ;;  %s1030_s10 = scalar_lea.vmem %s686_s9, 128  ;;  %p1035_p5 = scmp.lt.s32.totalorder %s686_s9, %s686_s9 }
 0x137   :  { %p1031_p4 = scmp.ne.s32.totalorder %s686_s9, %s1030_s10  ;;  %p1036_p6 = scmp.lt.s32.totalorder %s1030_s10, %s1030_s10 }
 0x138   :  { %489 = vmatprep.mubr.f32.mxu1 %v282_v6 }
 0x139   :  { %490 = vmatmul.mubr.f32.vlgmr.msra.gmra.mrb[0].mxu1 %v281_v5  ;;  %p1037_p7 = por %p1036_p6, %p1035_p5 }
 0x13a   :  { %897 = vmatpush3.bf16.msra.mxu1 %v896_v7 }
 0x13b   :  { %899 = vmatprep.subr.bf16.mxu1 %v898_v8  ;;  %p1038_p8 = pnand %p1037_p7, %p1031_p4 }
 0x13e   :  { %901 = vmatpush3.bf16.msra.mxu1 %v900_v12 }
 0x13f   :  { %903 = vmatprep.subr.bf16.mxu1 %v902_v14 }
 0x142   :  { %v276_v18 = vpop.f32.mrb[2].mxu0  ;;  %905 = vmatpush3.bf16.msra.mxu1 %v904_v26 }
 0x143   :  { %v277_v19 = vadd.f32 %v276_v18, %v126_v16  ;;  %v278_v20 = vpop.f32.mrb[3].mxu0  ;;  %907 = vmatprep.subr.bf16.mxu1 %v906_v29 }
 0x144   :  { %v279_v21 = vadd.f32 %v278_v20, %v130_v17 }
 0x145   :  { %v283_v23 = vmax.f32 %v277_v19, 0.0 }
 0x146   :  { %v284_v22 = vmax.f32 %v279_v21, 0.0  ;;  %909 = vmatpush3.bf16.msra.mxu1 %v908_v32 }
 0x147   :  { %911 = vmatprep.subr.bf16.mxu1 %v910_v36 }
 0x148   :  { %560 = vmatprep.mubr.f32.mxu0 %v284_v22 }
 0x149   :  { %561 = vmatmul.mubr.f32.vlgmr.msra.gmra.mrb[4].mxu0 %v283_v23 }
 0x14a   :  { %913 = vmatpush3.bf16.msra.mxu1 %v912_v40 }
 0x14b   :  { %915 = vmatprep.subr.bf16.mxu1 %v914_v41 }
 0x14e   :  { %917 = vmatpush3.bf16.msra.mxu1 %v916_v47 }
 0x14f   :  { %919 = vmatprep.subr.bf16.mxu1 %v918_v48 }
 0x152   :  { %921 = vmatpush3.bf16.msra.mxu1 %v920_v51 }
 0x153   :  { %923 = vmatprep.subr.bf16.mxu1 %v922_v54 }
 0x156   :  { %925 = vmatpush3.bf16.msra.mxu1 %v924_v59 }
 0x20c   :  { %v491_v60 = vpop.f32.mrb[0].mxu1 }
 0x20d   :  { %v493_v61 = vpop.f32.mrb[1].mxu1  ;;  %v492_v2 = vadd.f32 %v491_v60, %v418_v63 }
 0x20e   :  { %v494_v3 = vadd.f32 %v493_v61, %v422_v1 }
 0x21c   :  { %v562_v4 = vpop.f32.mrb[4].mxu0 }
 0x21d   :  { %v563_v5 = vadd.f32 %v562_v4, %v492_v2  ;;  %v564_v6 = vpop.f32.mrb[5].mxu0 }
 0x21e   :  { %v565_v7 = vadd.f32 %v564_v6, %v494_v3 }
 0x21f   :  { %v567_v9 = vmax.f32 %v563_v5, 0.0 }
 0x220   :  { %v568_v8 = vmax.f32 %v565_v7, 0.0 }
 0x222   :  { %672 = vmatprep.mubr.f32.mxu1 %v568_v8 }
 0x223   :  { %673 = vmatmul.mubr.f32.vlgmr.msra.gmra.mrb[2].mxu1 %v567_v9 }
 0x2f6   :  { %v731_v10 = vpop.f32.mrb[2].mxu1 }
 0x2f7   :  { %v732_v0 = vpop.f32.mrb[3].mxu1 }
 0x2f8   :  { %v733_v55 = vadd.f32 %v732_v0, %v731_v10 }
 0x2fa   :  { %v675_v45 = vadd.f32 %v733_v55, %v698_v11 }
 0x2fc   :  { %678 = vst [vmem:[#allocation10] sm:$0xff] %v675_v45 }
 0x2fd   :  { %1041 = shalt.err (!%p1038_p8)
}
 0x2fe   :  { %s1042_s0 = scalar_lea.hbm %s1210_s7, 128 }
 0x2ff   :  { %p1043_p9 = scmp.ne.s32.totalorder %s1210_s7, %s1042_s0  ;;  %p1046_p10 = scmp.lt.u32.totalorder %s1042_s0, %s1210_s7 }
 0x301   :  { %p1048_p11 = pnand %p1046_p10, %p1043_p9 }
 0x303   :  { %1051 = shalt.err (!%p1048_p11)
}
 0x304   :  { %688 = dma.vmem_to_hbm [thread:$0]  %s686_s9, 128, %s1210_s7, [#allocation4]  }
 0x305   :  { %1058 = dma.done.wait [#allocation4], 128  }
 0x306   :  { %1059 = vsyncadd [#allocation4], 4294967168 }
 0x307   :  { %692 = vsyncpa [#allocation3], 1 }
 0x308   :  { %693 = vsyncpa [#allocation6], 1 }
 0x309   :  { %694 = vsyncpa [#allocation9], 1 }
 0x30a   :  { %695 = vsyncpa [#allocation4], 1 }

// kernel: tpu_custom_call.1
= control target key start
LH: loop header
LB: loop body
LE: loop exit
PB: predicated region body
PF: predicated region fallthrough
CT: control target
= control target key end

     0   :  { %12 = vsyncpa [#allocation3], 0  ;;  %s1203_s0 = inlined_call_operand.hbm [shape: f32[8,64], index: 0, kind: input, shape index: {}]   ;;  %s1204_s1 = inlined_call_operand.hbm [shape: f32[64,512], index: 1, kind: input, shape index: {}]   ;;  %s1205_s2 = inlined_call_operand.vmem [shape: f32[1,512], index: 2, kind: input, shape index: {}]   ;;  %s1206_s3 = inlined_call_operand.hbm [shape: f32[512,256], index: 3, kind: input, shape index: {}]   ;;  %s1207_s4 = inlined_call_operand.vmem [shape: f32[1,256], index: 4, kind: input, shape index: {}]   ;;  %s1208_s5 = inlined_call_operand.hbm [shape: f32[256,128], index: 5, kind: input, shape index: {}]   ;;  %s1209_s6 = inlined_call_operand.vmem [shape: f32[1,128], index: 6, kind: input, shape index: {}]   ;;  %s1210_s7 = inlined_call_operand.hbm [shape: f32[8,128], index: 7, kind: output, shape index: {}]  }
   0x1   :  { %13 = vsyncpa [#allocation6], 0 }
   0x2   :  { %14 = vsyncpa [#allocation9], 0 }
   0x3   :  { %15 = vsyncpa [#allocation4], 0  ;;  %s1060_s24 = smov [#allocation5]   ;;  %s942_s28 = scalar_lea.hbm %s1204_s1, 4096 }
   0x4   :  { %s31_s25 = sshll.u32 %s1060_s24, 4  ;;  %p943_p0 = scmp.ne.s32.totalorder %s1204_s1, %s942_s28  ;;  %s32_s25 = int_to_ptr.vmem [resolvable:$true] %s31_s25 }
   0x5   :  { %p946_p1 = scmp.lt.u32.totalorder %s942_s28, %s1204_s1 }
   0x7   :  { %p948_p2 = pnand %p946_p1, %p943_p0 }
   0x9   :  { %951 = shalt.err (!%p948_p2)
}
   0xa   :  { %s952_s10 = scalar_lea.vmem %s32_s25, 4096  ;;  %p957_p4 = scmp.lt.s32.totalorder %s32_s25, %s32_s25 }
   0xb   :  { %p953_p3 = scmp.ne.s32.totalorder %s32_s25, %s952_s10  ;;  %p958_p5 = scmp.lt.s32.totalorder %s952_s10, %s952_s10 }
   0xd   :  { %p959_p6 = por %p958_p5, %p957_p4 }
   0xf   :  { %p960_p7 = pnand %p959_p6, %p953_p3 }
  0x11   :  { %963 = shalt.err (!%p960_p7)
}
  0x12   :  { %s1061_s11 = smov 512   ;;  %s1062_s12 = smov 32  }
  0x13   :  { %37 = dma.hbm_to_vmem [thread:$0]  %s1204_s1, 4096, %s32_s25, [#allocation6], %s1061_s11, %s1061_s11, %s1062_s12  }
  0x14   :  { %s1063_s15 = smov [#allocation2]   ;;  %s1064_s17 = smov [#allocation7]  }
  0x15   :  { %s22_s16 = sshll.u32 %s1063_s15, 4  ;;  %s45_s18 = sshll.u32 %s1064_s17, 4  ;;  %s23_s16 = int_to_ptr.vmem [resolvable:$true] %s22_s16  ;;  %s46_s18 = int_to_ptr.vmem [resolvable:$true] %s45_s18 }
  0x16   :  { %s964_s21 = scalar_lea.hbm %s1203_s0, 128 }
  0x17   :  { %p965_p8 = scmp.ne.s32.totalorder %s1203_s0, %s964_s21  ;;  %p968_p9 = scmp.lt.u32.totalorder %s964_s21, %s1203_s0 }
  0x19   :  { %p970_p10 = pnand %p968_p9, %p965_p8 }
  0x1b   :  { %973 = shalt.err (!%p970_p10)
}
  0x1c   :  { %s974_s1 = scalar_lea.vmem %s23_s16, 128  ;;  %p979_p12 = scmp.lt.s32.totalorder %s23_s16, %s23_s16 }
  0x1d   :  { %p975_p11 = scmp.ne.s32.totalorder %s23_s16, %s974_s1  ;;  %p980_p13 = scmp.lt.s32.totalorder %s974_s1, %s974_s1 }
  0x1f   :  { %p981_p0 = por %p980_p13, %p979_p12 }
  0x21   :  { %p982_p1 = pnand %p981_p0, %p975_p11 }
  0x23   :  { %985 = shalt.err (!%p982_p1)
}
  0x24   :  { %25 = dma.hbm_to_vmem [thread:$0]  %s1203_s0, 128, %s23_s16, [#allocation3]  }
  0x25   :  { %s986_s30 = scalar_lea.hbm %s1206_s3, 16384 }
  0x26   :  { %p987_p2 = scmp.ne.s32.totalorder %s1206_s3, %s986_s30  ;;  %p990_p3 = scmp.lt.u32.totalorder %s986_s30, %s1206_s3 }
  0x28   :  { %p992_p4 = pnand %p990_p3, %p987_p2 }
  0x2a   :  { %995 = shalt.err (!%p992_p4)
}
  0x2b   :  { %s996_s12 = scalar_lea.vmem %s46_s18, 16384  ;;  %p1001_p6 = scmp.lt.s32.totalorder %s46_s18, %s46_s18 }
  0x2c   :  { %p997_p5 = scmp.ne.s32.totalorder %s46_s18, %s996_s12  ;;  %p1002_p7 = scmp.lt.s32.totalorder %s996_s12, %s996_s12 }
  0x2e   :  { %p1003_p8 = por %p1002_p7, %p1001_p6 }
  0x30   :  { %p1004_p9 = pnand %p1003_p8, %p997_p5 }
  0x32   :  { %1007 = shalt.err (!%p1004_p9)
}
  0x33   :  { %s1065_s0 = smov 256   ;;  %s1066_s13 = smov 16  }
  0x34   :  { %51 = dma.hbm_to_vmem [thread:$0]  %s1206_s3, 16384, %s46_s18, [#allocation6], %s1065_s0, %s1065_s0, %s1066_s13  }
  0x35   :  { %s1067_s16 = smov [#allocation8]   ;;  %s1008_s21 = scalar_lea.hbm %s1208_s5, 4096 }
  0x36   :  { %s59_s17 = sshll.u32 %s1067_s16, 4  ;;  %p1009_p10 = scmp.ne.s32.totalorder %s1208_s5, %s1008_s21  ;;  %s60_s17 = int_to_ptr.vmem [resolvable:$true] %s59_s17 }
  0x37   :  { %p1012_p11 = scmp.lt.u32.totalorder %s1008_s21, %s1208_s5 }
  0x39   :  { %p1014_p12 = pnand %p1012_p11, %p1009_p10 }
  0x3b   :  { %1017 = shalt.err (!%p1014_p12)
}
  0x3c   :  { %s1018_s1 = scalar_lea.vmem %s60_s17, 4096  ;;  %p1023_p0 = scmp.lt.s32.totalorder %s60_s17, %s60_s17 }
  0x3d   :  { %p1019_p13 = scmp.ne.s32.totalorder %s60_s17, %s1018_s1  ;;  %p1024_p1 = scmp.lt.s32.totalorder %s1018_s1, %s1018_s1 }
  0x3f   :  { %p1025_p2 = por %p1024_p1, %p1023_p0 }
  0x41   :  { %p1026_p3 = pnand %p1025_p2, %p1019_p13 }
  0x43   :  { %1029 = shalt.err (!%p1026_p3)
}
  0x44   :  { %s1068_s3 = smov 128   ;;  %s1069_s18 = smov 8  }
  0x45   :  { %65 = dma.hbm_to_vmem [thread:$0]  %s1208_s5, 4096, %s60_s17, [#allocation9], %s1068_s3, %s1068_s3, %s1069_s18  }
  0x46   :  { %1052 = dma.done.wait [#allocation3], 128  }
  0x47   :  { %1053 = vsyncadd [#allocation3], 4294967168 }
  0x48   :  { %1054 = dma.done.wait [#allocation6], 20480  }
  0x49   :  { %1055 = vsyncadd [#allocation6], 4294946816 }
  0x4a   :  { %1056 = dma.done.wait [#allocation9], 4096  }
  0x4b   :  { %1057 = vsyncadd [#allocation9], 4294963200  ;;  %v1070_v0 = vmov 0.0   ;;  %v82_v1 = vld [vmem:[#allocation5 + $0x8] sm:$0xff]  ;;  %v81_v3 = vld [vmem:[#allocation5] sm:$0xff]  ;;  %vm135_vm0 = vcmask 523264  }
  0x4c   :  { %203 = vmatprep.mubr.f32.mxu0 %v1070_v0  ;;  %v86_v2 = vld [vmem:[#allocation5 + $0x28] sm:$0xff]  ;;  %v85_v5 = vld [vmem:[#allocation5 + $0x20] sm:$0xff]  ;;  %v84_v24 = vld [vmem:[#allocation5 + $0x18] sm:$0xff] }
  0x4d   :  { %v734_v4 = vpack.c.bf16 %v86_v2, %v82_v1  ;;  %v90_v6 = vld [vmem:[#allocation5 + $0x48] sm:$0xff]  ;;  %v736_v8 = vpack.c.bf16 %v85_v5, %v81_v3  ;;  %v89_v10 = vld [vmem:[#allocation5 + $0x40] sm:$0xff]  ;;  %v88_v25 = vld [vmem:[#allocation5 + $0x38] sm:$0xff] }
  0x4e   :  { %v94_v7 = vld [vmem:[#allocation5 + $0x68] sm:$0xff]  ;;  %v93_v11 = vld [vmem:[#allocation5 + $0x60] sm:$0xff]  ;;  %v83_v26 = vld [vmem:[#allocation5 + $0x10] sm:$0xff]  ;;  %v750_v36 = vpack.c.bf16 %v88_v25, %v84_v24 }
  0x4f   :  { %v738_v9 = vpack.c.bf16 %v94_v7, %v90_v6  ;;  %v98_v12 = vld [vmem:[#allocation5 + $0x88] sm:$0xff]  ;;  %735 = vmatprep.subr.bf16.mxu0 %v734_v4  ;;  %v740_v14 = vpack.c.bf16 %v93_v11, %v89_v10  ;;  %v97_v16 = vld [vmem:[#allocation5 + $0x80] sm:$0xff]  ;;  %v87_v27 = vld [vmem:[#allocation5 + $0x30] sm:$0xff] }
  0x50   :  { %v102_v13 = vld [vmem:[#allocation5 + $0xa8] sm:$0xff]  ;;  %737 = vmatpush1.bf16.msra.mxu0 %v736_v8  ;;  %v101_v17 = vld [vmem:[#allocation5 + $0xa0] sm:$0xff]  ;;  %v288_v29 = vld [vmem:[#allocation7 + $0x18] sm:$0xff]  ;;  %v752_v47 = vpack.c.bf16 %v87_v27, %v83_v26 }
  0x51   :  { %739 = vmatprep.subr.bf16.mxu0 %v738_v9  ;;  %v742_v15 = vpack.c.bf16 %v102_v13, %v98_v12  ;;  %v106_v18 = vld [vmem:[#allocation5 + $0xc8] sm:$0xff]  ;;  %v744_v20 = vpack.c.bf16 %v101_v17, %v97_v16  ;;  %v105_v22 = vld [vmem:[#allocation5 + $0xc0] sm:$0xff]  ;;  %v287_v33 = vld [vmem:[#allocation7 + $0x10] sm:$0xff] }
  0x52   :  { %v110_v19 = vld [vmem:[#allocation5 + $0xe8] sm:$0xff]  ;;  %v109_v23 = vld [vmem:[#allocation5 + $0xe0] sm:$0xff]  ;;  %v292_v35 = vld [vmem:[#allocation7 + $0x38] sm:$0xff] }
  0x53   :  { %v746_v21 = vpack.c.bf16 %v110_v19, %v106_v18  ;;  %v286_v28 = vld [vmem:[#allocation7 + $0x8] sm:$0xff]  ;;  %v285_v30 = vld [vmem:[#allocation7] sm:$0xff]  ;;  %v748_v31 = vpack.c.bf16 %v109_v23, %v105_v22  ;;  %v92_v37 = vld [vmem:[#allocation5 + $0x58] sm:$0xff] }
  0x54   :  { %741 = vmatpush1.bf16.msra.mxu0 %v740_v14  ;;  %v766_v32 = vpack.c.bf16 %v288_v29, %v286_v28  ;;  %v290_v34 = vld [vmem:[#allocation7 + $0x28] sm:$0xff]  ;;  %v768_v38 = vpack.c.bf16 %v287_v33, %v285_v30  ;;  %v289_v40 = vld [vmem:[#allocation7 + $0x20] sm:$0xff]  ;;  %v291_v41 = vld [vmem:[#allocation7 + $0x30] sm:$0xff] }
  0x55   :  { %743 = vmatprep.subr.bf16.mxu0 %v742_v15  ;;  %v770_v39 = vpack.c.bf16 %v292_v35, %v290_v34  ;;  %v96_v42 = vld [vmem:[#allocation5 + $0x78] sm:$0xff]  ;;  %v294_v43 = vld [vmem:[#allocation7 + $0x48] sm:$0xff]  ;;  %v772_v46 = vpack.c.bf16 %v291_v41, %v289_v40  ;;  %v91_v48 = vld [vmem:[#allocation5 + $0x50] sm:$0xff] }
  0x56   :  { %767 = vmatprep.subr.bf16.mxu1 %v766_v32  ;;  %v296_v44 = vld [vmem:[#allocation7 + $0x58] sm:$0xff]  ;;  %v293_v49 = vld [vmem:[#allocation7 + $0x40] sm:$0xff]  ;;  %v295_v50 = vld [vmem:[#allocation7 + $0x50] sm:$0xff]  ;;  %v754_v51 = vpack.c.bf16 %v96_v42, %v92_v37 }
  0x57   :  { %v1161_v45 = vld [vmem:[#allocation2] sm:$0xff]  ;;  %769 = vmatpush1.bf16.msra.mxu1 %v768_v38  ;;  %v95_v52 = vld [vmem:[#allocation5 + $0x70] sm:$0xff]  ;;  %v774_v53 = vpack.c.bf16 %v296_v44, %v294_v43  ;;  %v298_v54 = vld [vmem:[#allocation7 + $0x68] sm:$0xff]  ;;  %v776_v58 = vpack.c.bf16 %v295_v50, %v293_v49 }
  0x58   :  { %745 = vmatpush1.bf16.msra.mxu0 %v744_v20  ;;  %771 = vmatprep.subr.bf16.mxu1 %v770_v39  ;;  %v300_v55 = vld [vmem:[#allocation7 + $0x78] sm:$0xff]  ;;  %v756_v59 = vpack.c.bf16 %v95_v52, %v91_v48  ;;  %v99_v60 = vld [vmem:[#allocation5 + $0x90] sm:$0xff]  ;;  %v297_v62 = vld [vmem:[#allocation7 + $0x60] sm:$0xff] }
  0x59   :  { %747 = vmatprep.subr.bf16.mxu0 %v746_v21  ;;  %v100_v56 = vld [vmem:[#allocation5 + $0x98] sm:$0xff]  ;;  %v778_v61 = vpack.c.bf16 %v300_v55, %v298_v54  ;;  %v299_v63 = vld [vmem:[#allocation7 + $0x70] sm:$0xff]  ;;  %v302_v3 = vld [vmem:[#allocation7 + $0x88] sm:$0xff] }
  0x5a   :  { %v104_v57 = vld [vmem:[#allocation5 + $0xb8] sm:$0xff]  ;;  %v103_v2 = vld [vmem:[#allocation5 + $0xb0] sm:$0xff]  ;;  %v780_v7 = vpack.c.bf16 %v299_v63, %v297_v62  ;;  %v301_v11 = vld [vmem:[#allocation7 + $0x80] sm:$0xff] }
  0x5b   :  { %773 = vmatpush1.bf16.msra.mxu1 %v772_v46  ;;  %v758_v1 = vpack.c.bf16 %v104_v57, %v100_v56  ;;  %v304_v4 = vld [vmem:[#allocation7 + $0x98] sm:$0xff]  ;;  %v760_v8 = vpack.c.bf16 %v103_v2, %v99_v60  ;;  %v107_v9 = vld [vmem:[#allocation5 + $0xd0] sm:$0xff]  ;;  %v306_v14 = vld [vmem:[#allocation7 + $0xa8] sm:$0xff] }
  0x5c   :  { %749 = vmatpush1.bf16.msra.mxu0 %v748_v31  ;;  %775 = vmatprep.subr.bf16.mxu1 %v774_v53  ;;  %v108_v5 = vld [vmem:[#allocation5 + $0xd8] sm:$0xff]  ;;  %v782_v10 = vpack.c.bf16 %v304_v4, %v302_v3  ;;  %v111_v13 = vld [vmem:[#allocation5 + $0xf0] sm:$0xff]  ;;  %v350_v16 = vld [vmem:[#allocation7 + $0x208] sm:$0xff] }
  0x5d   :  { %751 = vmatprep.subr.bf16.mxu0 %v750_v36  ;;  %v112_v6 = vld [vmem:[#allocation5 + $0xf8] sm:$0xff]  ;;  %v764_v19 = vpack.c.bf16 %v111_v13, %v107_v9  ;;  %v349_v20 = vld [vmem:[#allocation7 + $0x200] sm:$0xff]  ;;  %v307_v23 = vld [vmem:[#allocation7 + $0xb0] sm:$0xff] }
  0x5e   :  { %v762_v12 = vpack.c.bf16 %v112_v6, %v108_v5  ;;  %v308_v15 = vld [vmem:[#allocation7 + $0xb8] sm:$0xff]  ;;  %v305_v22 = vld [vmem:[#allocation7 + $0xa0] sm:$0xff]  ;;  %v351_v25 = vld [vmem:[#allocation7 + $0x210] sm:$0xff] }
  0x5f   :  { %696 = vmatmul.mubr.msk.f32.vlgmr.msra.gmra.mrb[0].mxu0 %vm135_vm0, %v1161_v45  ;;  %777 = vmatpush1.bf16.msra.mxu1 %v776_v58  ;;  %v352_v17 = vld [vmem:[#allocation7 + $0x218] sm:$0xff]  ;;  %v786_v21 = vpack.c.bf16 %v308_v15, %v306_v14  ;;  %v310_v26 = vld [vmem:[#allocation7 + $0xc8] sm:$0xff]  ;;  %v788_v30 = vpack.c.bf16 %v307_v23, %v305_v22  ;;  %v832_v31 = vpack.c.bf16 %v351_v25, %v349_v20  ;;  %v353_v32 = vld [vmem:[#allocation7 + $0x220] sm:$0xff] }
  0x60   :  { %753 = vmatpush1.bf16.msra.mxu0 %v752_v47  ;;  %274 = vmatprep.mubr.f32.mxu0 %v1070_v0  ;;  %v303_v0 = vld [vmem:[#allocation7 + $0x90] sm:$0xff]  ;;  %v830_v24 = vpack.c.bf16 %v352_v17, %v350_v16  ;;  %v312_v27 = vld [vmem:[#allocation7 + $0xd8] sm:$0xff]  ;;  %v354_v28 = vld [vmem:[#allocation7 + $0x228] sm:$0xff] }
  0x61   :  { %755 = vmatprep.subr.bf16.mxu0 %v754_v51  ;;  %779 = vmatprep.subr.bf16.mxu1 %v778_v61  ;;  %v784_v18 = vpack.c.bf16 %v303_v0, %v301_v11  ;;  %v356_v29 = vld [vmem:[#allocation7 + $0x238] sm:$0xff]  ;;  %v790_v33 = vpack.c.bf16 %v312_v27, %v310_v26  ;;  %v309_v34 = vld [vmem:[#allocation7 + $0xc0] sm:$0xff]  ;;  %v311_v35 = vld [vmem:[#allocation7 + $0xd0] sm:$0xff] }
  0x62   :  { %v834_v36 = vpack.c.bf16 %v356_v29, %v354_v28  ;;  %v355_v37 = vld [vmem:[#allocation7 + $0x230] sm:$0xff]  ;;  %v314_v38 = vld [vmem:[#allocation7 + $0xe8] sm:$0xff]  ;;  %v316_v39 = vld [vmem:[#allocation7 + $0xf8] sm:$0xff]  ;;  %v792_v42 = vpack.c.bf16 %v311_v35, %v309_v34 }
  0x63   :  { %781 = vmatpush1.bf16.msra.mxu1 %v780_v7  ;;  %v358_v40 = vld [vmem:[#allocation7 + $0x248] sm:$0xff]  ;;  %v360_v41 = vld [vmem:[#allocation7 + $0x258] sm:$0xff]  ;;  %v836_v43 = vpack.c.bf16 %v355_v37, %v353_v32  ;;  %v357_v44 = vld [vmem:[#allocation7 + $0x240] sm:$0xff]  ;;  %v794_v46 = vpack.c.bf16 %v316_v39, %v314_v38 }
  0x64   :  { %757 = vmatpush1.bf16.msra.mxu0 %v756_v59  ;;  %783 = vmatprep.subr.bf16.mxu1 %v782_v10  ;;  %v313_v47 = vld [vmem:[#allocation7 + $0xe0] sm:$0xff]  ;;  %v315_v48 = vld [vmem:[#allocation7 + $0xf0] sm:$0xff]  ;;  %v838_v49 = vpack.c.bf16 %v360_v41, %v358_v40  ;;  %v318_v51 = vld [vmem:[#allocation7 + $0x108] sm:$0xff] }
  0x65   :  { %759 = vmatprep.subr.bf16.mxu0 %v758_v1  ;;  %v359_v50 = vld [vmem:[#allocation7 + $0x250] sm:$0xff]  ;;  %v320_v52 = vld [vmem:[#allocation7 + $0x118] sm:$0xff]  ;;  %v362_v53 = vld [vmem:[#allocation7 + $0x268] sm:$0xff]  ;;  %v796_v55 = vpack.c.bf16 %v315_v48, %v313_v47 }
  0x66   :  { %v364_v54 = vld [vmem:[#allocation7 + $0x278] sm:$0xff]  ;;  %v361_v56 = vld [vmem:[#allocation7 + $0x260] sm:$0xff]  ;;  %v798_v57 = vpack.c.bf16 %v320_v52, %v318_v51  ;;  %v319_v59 = vld [vmem:[#allocation7 + $0x110] sm:$0xff] }
  0x67   :  { %785 = vmatpush1.bf16.msra.mxu1 %v784_v18  ;;  %v317_v58 = vld [vmem:[#allocation7 + $0x100] sm:$0xff]  ;;  %v842_v60 = vpack.c.bf16 %v364_v54, %v362_v53  ;;  %v363_v61 = vld [vmem:[#allocation7 + $0x270] sm:$0xff]  ;;  %v322_v62 = vld [vmem:[#allocation7 + $0x128] sm:$0xff] }
  0x68   :  { %761 = vmatpush1.bf16.msra.mxu0 %v760_v8  ;;  %787 = vmatprep.subr.bf16.mxu1 %v786_v21  ;;  %v324_v63 = vld [vmem:[#allocation7 + $0x138] sm:$0xff]  ;;  %v366_v1 = vld [vmem:[#allocation7 + $0x288] sm:$0xff]  ;;  %v800_v3 = vpack.c.bf16 %v319_v59, %v317_v58  ;;  %v844_v4 = vpack.c.bf16 %v363_v61, %v361_v56  ;;  %v365_v5 = vld [vmem:[#allocation7 + $0x280] sm:$0xff] }
  0x69   :  { %763 = vmatprep.subr.bf16.mxu0 %v762_v12  ;;  %v368_v2 = vld [vmem:[#allocation7 + $0x298] sm:$0xff]  ;;  %v802_v6 = vpack.c.bf16 %v324_v63, %v322_v62  ;;  %v321_v7 = vld [vmem:[#allocation7 + $0x120] sm:$0xff]  ;;  %v323_v8 = vld [vmem:[#allocation7 + $0x130] sm:$0xff] }
  0x6a   :  { %v846_v9 = vpack.c.bf16 %v368_v2, %v366_v1  ;;  %v367_v10 = vld [vmem:[#allocation7 + $0x290] sm:$0xff]  ;;  %v326_v11 = vld [vmem:[#allocation7 + $0x148] sm:$0xff]  ;;  %v328_v0 = vld [vmem:[#allocation7 + $0x158] sm:$0xff]  ;;  %v804_v14 = vpack.c.bf16 %v323_v8, %v321_v7 }
  0x6b   :  { %789 = vmatpush1.bf16.msra.mxu1 %v788_v30  ;;  %v370_v12 = vld [vmem:[#allocation7 + $0x2a8] sm:$0xff]  ;;  %v372_v13 = vld [vmem:[#allocation7 + $0x2b8] sm:$0xff]  ;;  %v848_v15 = vpack.c.bf16 %v367_v10, %v365_v5  ;;  %v369_v16 = vld [vmem:[#allocation7 + $0x2a0] sm:$0xff]  ;;  %v806_v17 = vpack.c.bf16 %v328_v0, %v326_v11 }
  0x6c   :  { %765 = vmatpush1.bf16.msra.mxu0 %v764_v19  ;;  %791 = vmatprep.subr.bf16.mxu1 %v790_v33  ;;  %v325_v18 = vld [vmem:[#allocation7 + $0x140] sm:$0xff]  ;;  %v327_v19 = vld [vmem:[#allocation7 + $0x150] sm:$0xff]  ;;  %v850_v20 = vpack.c.bf16 %v372_v13, %v370_v12  ;;  %v330_v22 = vld [vmem:[#allocation7 + $0x168] sm:$0xff] }
  0x6d   :  { %831 = vmatprep.subr.bf16.mxu0 %v830_v24  ;;  %v371_v21 = vld [vmem:[#allocation7 + $0x2b0] sm:$0xff]  ;;  %v332_v23 = vld [vmem:[#allocation7 + $0x178] sm:$0xff]  ;;  %v374_v24 = vld [vmem:[#allocation7 + $0x2c8] sm:$0xff]  ;;  %v808_v26 = vpack.c.bf16 %v327_v19, %v325_v18 }
  0x6e   :  { %v376_v25 = vld [vmem:[#allocation7 + $0x2d8] sm:$0xff]  ;;  %v852_v27 = vpack.c.bf16 %v371_v21, %v369_v16  ;;  %v373_v28 = vld [vmem:[#allocation7 + $0x2c0] sm:$0xff]  ;;  %v810_v29 = vpack.c.bf16 %v332_v23, %v330_v22  ;;  %v375_v33 = vld [vmem:[#allocation7 + $0x2d0] sm:$0xff] }
  0x6f   :  { %697 = vmatmul.mubr.msk.f32.vlgmr.msra.gmra.mrb[2].mxu0 %vm135_vm0, %v1161_v45  ;;  %793 = vmatpush1.bf16.msra.mxu1 %v792_v42  ;;  %v840_v45 = vpack.c.bf16 %v359_v50, %v357_v44  ;;  %v329_v30 = vld [vmem:[#allocation7 + $0x160] sm:$0xff]  ;;  %v854_v32 = vpack.c.bf16 %v376_v25, %v374_v24  ;;  %v334_v34 = vld [vmem:[#allocation7 + $0x188] sm:$0xff]  ;;  %v336_v35 = vld [vmem:[#allocation7 + $0x198] sm:$0xff]  ;;  %v856_v39 = vpack.c.bf16 %v375_v33, %v373_v28 }
  0x70   :  { %833 = vmatpush1.bf16.msra.mxu0 %v832_v31  ;;  %795 = vmatprep.subr.bf16.mxu1 %v794_v46  ;;  %v331_v31 = vld [vmem:[#allocation7 + $0x170] sm:$0xff]  ;;  %v380_v37 = vld [vmem:[#allocation7 + $0x2f8] sm:$0xff]  ;;  %v377_v40 = vld [vmem:[#allocation7 + $0x2e0] sm:$0xff]  ;;  %v814_v41 = vpack.c.bf16 %v336_v35, %v334_v34 }
  0x71   :  { %835 = vmatprep.subr.bf16.mxu0 %v834_v36  ;;  %v378_v36 = vld [vmem:[#allocation7 + $0x2e8] sm:$0xff]  ;;  %v812_v38 = vpack.c.bf16 %v331_v31, %v329_v30  ;;  %v333_v42 = vld [vmem:[#allocation7 + $0x180] sm:$0xff]  ;;  %v379_v46 = vld [vmem:[#allocation7 + $0x2f0] sm:$0xff] }
  0x72   :  { %v858_v44 = vpack.c.bf16 %v380_v37, %v378_v36  ;;  %v338_v47 = vld [vmem:[#allocation7 + $0x1a8] sm:$0xff]  ;;  %v340_v48 = vld [vmem:[#allocation7 + $0x1b8] sm:$0xff]  ;;  %v860_v52 = vpack.c.bf16 %v379_v46, %v377_v40  ;;  %v381_v53 = vld [vmem:[#allocation7 + $0x300] sm:$0xff] }
  0x73   :  { %797 = vmatpush1.bf16.msra.mxu1 %v796_v55  ;;  %v384_v50 = vld [vmem:[#allocation7 + $0x318] sm:$0xff]  ;;  %v818_v54 = vpack.c.bf16 %v340_v48, %v338_v47  ;;  %v337_v55 = vld [vmem:[#allocation7 + $0x1a0] sm:$0xff]  ;;  %v342_v58 = vld [vmem:[#allocation7 + $0x1c8] sm:$0xff] }
  0x74   :  { %837 = vmatpush1.bf16.msra.mxu0 %v836_v43  ;;  %799 = vmatprep.subr.bf16.mxu1 %v798_v57  ;;  %v335_v43 = vld [vmem:[#allocation7 + $0x190] sm:$0xff]  ;;  %v344_v59 = vld [vmem:[#allocation7 + $0x1d8] sm:$0xff]  ;;  %v390_v5 = vld [vmem:[#allocation7 + $0x348] sm:$0xff] }
  0x75   :  { %839 = vmatprep.subr.bf16.mxu0 %v838_v49  ;;  %v382_v49 = vld [vmem:[#allocation7 + $0x308] sm:$0xff]  ;;  %v816_v51 = vpack.c.bf16 %v335_v43, %v333_v42  ;;  %v383_v57 = vld [vmem:[#allocation7 + $0x310] sm:$0xff]  ;;  %v388_v61 = vld [vmem:[#allocation7 + $0x338] sm:$0xff]  ;;  %v822_v1 = vpack.c.bf16 %v344_v59, %v342_v58 }
  0x76   :  { %v862_v56 = vpack.c.bf16 %v384_v50, %v382_v49  ;;  %v864_v63 = vpack.c.bf16 %v383_v57, %v381_v53  ;;  %v343_v10 = vld [vmem:[#allocation7 + $0x1d0] sm:$0xff]  ;;  %v389_v11 = vld [vmem:[#allocation7 + $0x340] sm:$0xff]  ;;  %v394_v16 = vld [vmem:[#allocation7 + $0x368] sm:$0xff] }
  0x77   :  { %801 = vmatpush1.bf16.msra.mxu1 %v800_v3  ;;  %v385_v3 = vld [vmem:[#allocation7 + $0x320] sm:$0xff]  ;;  %v391_v12 = vld [vmem:[#allocation7 + $0x350] sm:$0xff]  ;;  %v396_v18 = vld [vmem:[#allocation7 + $0x378] sm:$0xff] }
  0x78   :  { %841 = vmatpush1.bf16.msra.mxu0 %v840_v45  ;;  %803 = vmatprep.subr.bf16.mxu1 %v802_v6  ;;  %v339_v45 = vld [vmem:[#allocation7 + $0x1b0] sm:$0xff]  ;;  %v392_v6 = vld [vmem:[#allocation7 + $0x358] sm:$0xff]  ;;  %v872_v13 = vpack.c.bf16 %v391_v12, %v389_v11  ;;  %v345_v19 = vld [vmem:[#allocation7 + $0x1e0] sm:$0xff]  ;;  %v874_v21 = vpack.c.bf16 %v396_v18, %v394_v16 }
  0x79   :  { %843 = vmatprep.subr.bf16.mxu0 %v842_v60  ;;  %v386_v60 = vld [vmem:[#allocation7 + $0x328] sm:$0xff]  ;;  %v820_v62 = vpack.c.bf16 %v339_v45, %v337_v55  ;;  %v870_v8 = vpack.c.bf16 %v392_v6, %v390_v5  ;;  %v393_v23 = vld [vmem:[#allocation7 + $0x360] sm:$0xff]  ;;  %v395_v24 = vld [vmem:[#allocation7 + $0x370] sm:$0xff] }
  0x7a   :  { %v866_v2 = vpack.c.bf16 %v388_v61, %v386_v60  ;;  %v876_v25 = vpack.c.bf16 %v395_v24, %v393_v23  ;;  %v399_v30 = vld [vmem:[#allocation7 + $0x390] sm:$0xff]  ;;  %v404_v33 = vld [vmem:[#allocation7 + $0x3b8] sm:$0xff]  ;;  %v401_v34 = vld [vmem:[#allocation7 + $0x3a0] sm:$0xff] }
  0x7b   :  { %805 = vmatpush1.bf16.msra.mxu1 %v804_v14  ;;  %v346_v14 = vld [vmem:[#allocation7 + $0x1e8] sm:$0xff]  ;;  %v403_v36 = vld [vmem:[#allocation7 + $0x3b0] sm:$0xff]  ;;  %v412_v46 = vld [vmem:[#allocation7 + $0x3f8] sm:$0xff] }
  0x7c   :  { %845 = vmatpush1.bf16.msra.mxu0 %v844_v4  ;;  %807 = vmatprep.subr.bf16.mxu1 %v806_v17  ;;  %v387_v4 = vld [vmem:[#allocation7 + $0x330] sm:$0xff]  ;;  %v406_v37 = vld [vmem:[#allocation7 + $0x3c8] sm:$0xff]  ;;  %v409_v48 = vld [vmem:[#allocation7 + $0x3e0] sm:$0xff] }
  0x7d   :  { %847 = vmatprep.subr.bf16.mxu0 %v846_v9  ;;  %v868_v7 = vpack.c.bf16 %v387_v4, %v385_v3  ;;  %v341_v9 = vld [vmem:[#allocation7 + $0x1c0] sm:$0xff]  ;;  %v407_v42 = vld [vmem:[#allocation7 + $0x3d0] sm:$0xff]  ;;  %v588_v4 = vld [vmem:[#allocation8 + $0x98] sm:$0xff] }
  0x7e   :  { %v824_v0 = vpack.c.bf16 %v343_v10, %v341_v9  ;;  %v411_v49 = vld [vmem:[#allocation7 + $0x3f0] sm:$0xff]  ;;  %v572_v10 = vld [vmem:[#allocation8 + $0x18] sm:$0xff]  ;;  %v589_v11 = vld [vmem:[#allocation8 + $0xa0] sm:$0xff] }
  0x7f   :  { %809 = vmatpush1.bf16.msra.mxu1 %v808_v26  ;;  %v398_v26 = vld [vmem:[#allocation7 + $0x388] sm:$0xff]  ;;  %v892_v50 = vpack.c.bf16 %v411_v49, %v409_v48  ;;  %v587_v3 = vld [vmem:[#allocation8 + $0x90] sm:$0xff]  ;;  %v573_v24 = vld [vmem:[#allocation8 + $0x20] sm:$0xff] }
  0x80   :  { %849 = vmatpush1.bf16.msra.mxu0 %v848_v15  ;;  %811 = vmatprep.subr.bf16.mxu1 %v810_v29  ;;  %v348_v15 = vld [vmem:[#allocation7 + $0x1f8] sm:$0xff]  ;;  %v397_v29 = vld [vmem:[#allocation7 + $0x380] sm:$0xff]  ;;  %v571_v9 = vld [vmem:[#allocation8 + $0x10] sm:$0xff] }
  0x81   :  { %851 = vmatprep.subr.bf16.mxu0 %v850_v20  ;;  %v826_v17 = vpack.c.bf16 %v348_v15, %v346_v14  ;;  %v347_v20 = vld [vmem:[#allocation7 + $0x1f0] sm:$0xff]  ;;  %v880_v31 = vpack.c.bf16 %v399_v30, %v397_v29  ;;  %v900_v12 = vpack.c.bf16 %v572_v10, %v571_v9  ;;  %v581_v49 = vld [vmem:[#allocation8 + $0x60] sm:$0xff] }
  0x82   :  { %v828_v22 = vpack.c.bf16 %v347_v20, %v345_v19  ;;  %v575_v30 = vld [vmem:[#allocation8 + $0x30] sm:$0xff] }
  0x83   :  { %813 = vmatpush1.bf16.msra.mxu1 %v812_v38  ;;  %v408_v38 = vld [vmem:[#allocation7 + $0x3d8] sm:$0xff] }
  0x84   :  { %853 = vmatpush1.bf16.msra.mxu0 %v852_v27  ;;  %815 = vmatprep.subr.bf16.mxu1 %v814_v41  ;;  %v400_v27 = vld [vmem:[#allocation7 + $0x398] sm:$0xff]  ;;  %v886_v40 = vpack.c.bf16 %v408_v38, %v406_v37  ;;  %v405_v41 = vld [vmem:[#allocation7 + $0x3c0] sm:$0xff]  ;;  %v578_v37 = vld [vmem:[#allocation8 + $0x48] sm:$0xff] }
  0x85   :  { %855 = vmatprep.subr.bf16.mxu0 %v854_v32  ;;  %v878_v28 = vpack.c.bf16 %v400_v27, %v398_v26  ;;  %v402_v32 = vld [vmem:[#allocation7 + $0x3a8] sm:$0xff]  ;;  %v888_v43 = vpack.c.bf16 %v407_v42, %v405_v41  ;;  %v591_v27 = vld [vmem:[#allocation8 + $0xb0] sm:$0xff] }
  0x86   :  { %v882_v35 = vpack.c.bf16 %v404_v33, %v402_v32  ;;  %v593_v33 = vld [vmem:[#allocation8 + $0xc0] sm:$0xff]  ;;  %v595_v38 = vld [vmem:[#allocation8 + $0xd0] sm:$0xff] }
  0x87   :  { %817 = vmatpush1.bf16.msra.mxu1 %v816_v51  ;;  %v585_v51 = vld [vmem:[#allocation8 + $0x80] sm:$0xff]  ;;  %v579_v42 = vld [vmem:[#allocation8 + $0x50] sm:$0xff] }
  0x88   :  { %857 = vmatpush1.bf16.msra.mxu0 %v856_v39  ;;  %819 = vmatprep.subr.bf16.mxu1 %v818_v54  ;;  %v884_v39 = vpack.c.bf16 %v403_v36, %v401_v34  ;;  %v115_v54 = vlaneseq  ;;  %v594_v34 = vld [vmem:[#allocation8 + $0xc8] sm:$0xff] }
  0x89   :  { %859 = vmatprep.subr.bf16.mxu0 %v858_v44  ;;  %v410_v44 = vld [vmem:[#allocation7 + $0x3e8] sm:$0xff]  ;;  %v910_v36 = vpack.c.bf16 %v594_v34, %v593_v33 }
  0x8a   :  { %v890_v47 = vpack.c.bf16 %v412_v46, %v410_v44  ;;  %v1168_v55 = vshrl.u32 %v115_v54, 7  ;;  %v597_v44 = vld [vmem:[#allocation8 + $0xe0] sm:$0xff]  ;;  %v598_v46 = vld [vmem:[#allocation8 + $0xe8] sm:$0xff] }
  0x8b   :  { %821 = vmatpush1.bf16.msra.mxu1 %v820_v62  ;;  %v918_v48 = vpack.c.bf16 %v598_v46, %v597_v44 }
  0x8c   :  { %861 = vmatpush1.bf16.msra.mxu0 %v860_v52  ;;  %823 = vmatprep.subr.bf16.mxu1 %v822_v1  ;;  %v586_v52 = vld [vmem:[#allocation8 + $0x88] sm:$0xff]  ;;  %v117_v45 = vsub.s32 0, %v1168_v55  ;;  %v121_v57 = vsub.s32 1, %v1168_v55  ;;  %v129_v15 = vsub.s32 3, %v1168_v55 }
  0x8d   :  { %863 = vmatprep.subr.bf16.mxu0 %v862_v56  ;;  %v894_v53 = vpack.c.bf16 %v586_v52, %v585_v51  ;;  %v113_v56 = vld [vmem:[%s1205_s2] sm:$0xf]  ;;  %v570_v1 = vld [vmem:[#allocation8 + $0x8] sm:$0xff]  ;;  %v599_v52 = vld [vmem:[#allocation8 + $0xf0] sm:$0xff] }
  0x8e   :  { %v118_v58 = vrot.slane %v113_v56, %v117_v45  ;;  %v122_v59 = vrot.slane %v113_v56, %v121_v57 }
  0x8f   :  { %825 = vmatpush1.bf16.msra.mxu1 %v824_v0  ;;  %v590_v0 = vld [vmem:[#allocation8 + $0xa8] sm:$0xff] }
  0x90   :  { %865 = vmatpush1.bf16.msra.mxu0 %v864_v63  ;;  %827 = vmatprep.subr.bf16.mxu1 %v826_v17  ;;  %v569_v63 = vld [vmem:[#allocation8] sm:$0xff]  ;;  %v902_v14 = vpack.c.bf16 %v590_v0, %v589_v11  ;;  %v130_v17 = vrot.slane %v113_v56, %v129_v15  ;;  %v698_v11 = vld [vmem:[%s1209_s6] ss:$0 sm:$0xff] }
  0x91   :  { %867 = vmatprep.subr.bf16.mxu0 %v866_v2 }
  0x93   :  { %829 = vmatpush1.bf16.msra.mxu1 %v828_v22 }
  0x94   :  { %869 = vmatpush1.bf16.msra.mxu0 %v868_v7  ;;  %895 = vmatprep.subr.bf16.mxu1 %v894_v53  ;;  %v896_v7 = vpack.c.bf16 %v570_v1, %v569_v63  ;;  %v600_v53 = vld [vmem:[#allocation8 + $0xf8] sm:$0xff] }
  0x95   :  { %871 = vmatprep.subr.bf16.mxu0 %v870_v8  ;;  %v898_v8 = vpack.c.bf16 %v588_v4, %v587_v3  ;;  %v922_v54 = vpack.c.bf16 %v600_v53, %v599_v52 }
  0x98   :  { %873 = vmatpush1.bf16.msra.mxu0 %v872_v13  ;;  %v125_v13 = vsub.s32 2, %v1168_v55 }
  0x99   :  { %875 = vmatprep.subr.bf16.mxu0 %v874_v21 }
  0x9a   :  { %v126_v16 = vrot.slane %v113_v56, %v125_v13  ;;  %v583_v56 = vld [vmem:[#allocation8 + $0x70] sm:$0xff] }
  0x9c   :  { %877 = vmatpush1.bf16.msra.mxu0 %v876_v25  ;;  %v574_v25 = vld [vmem:[#allocation8 + $0x28] sm:$0xff] }
  0x9d   :  { %879 = vmatprep.subr.bf16.mxu0 %v878_v28  ;;  %v904_v26 = vpack.c.bf16 %v574_v25, %v573_v24  ;;  %v592_v28 = vld [vmem:[#allocation8 + $0xb8] sm:$0xff] }
  0x9e   :  { %v906_v29 = vpack.c.bf16 %v592_v28, %v591_v27 }
  0xa0   :  { %881 = vmatpush1.bf16.msra.mxu0 %v880_v31  ;;  %v576_v31 = vld [vmem:[#allocation8 + $0x38] sm:$0xff] }
  0xa1   :  { %883 = vmatprep.subr.bf16.mxu0 %v882_v35  ;;  %v908_v32 = vpack.c.bf16 %v576_v31, %v575_v30  ;;  %v577_v35 = vld [vmem:[#allocation8 + $0x40] sm:$0xff] }
  0xa4   :  { %885 = vmatpush1.bf16.msra.mxu0 %v884_v39  ;;  %v596_v39 = vld [vmem:[#allocation8 + $0xd8] sm:$0xff] }
  0xa5   :  { %887 = vmatprep.subr.bf16.mxu0 %v886_v40  ;;  %v912_v40 = vpack.c.bf16 %v578_v37, %v577_v35  ;;  %v914_v41 = vpack.c.bf16 %v596_v39, %v595_v38 }
  0xa8   :  { %889 = vmatpush1.bf16.msra.mxu0 %v888_v43  ;;  %v580_v43 = vld [vmem:[#allocation8 + $0x58] sm:$0xff] }
  0xa9   :  { %891 = vmatprep.subr.bf16.mxu0 %v890_v47  ;;  %v916_v47 = vpack.c.bf16 %v580_v43, %v579_v42 }
  0xac   :  { %893 = vmatpush1.bf16.msra.mxu0 %v892_v50  ;;  %v582_v50 = vld [vmem:[#allocation8 + $0x68] sm:$0xff] }
  0xad   :  { %v920_v51 = vpack.c.bf16 %v582_v50, %v581_v49 }
 0x132   :  { %v205_v60 = vpop.f32.mrb[0].mxu0 }
 0x133   :  { %v206_v61 = vadd.f32 %v205_v60, %v118_v58  ;;  %v207_v62 = vpop.f32.mrb[1].mxu0  ;;  %v584_v58 = vld [vmem:[#allocation8 + $0x78] sm:$0xff] }
 0x134   :  { %v208_v2 = vadd.f32 %v207_v62, %v122_v59  ;;  %v924_v59 = vpack.c.bf16 %v584_v58, %v583_v56  ;;  %v413_v62 = vld [vmem:[%s1207_s4] sm:$0x3]  ;;  %s1071_s4 = smov [#allocation10]  }
 0x135   :  { %v281_v5 = vmax.f32 %v206_v61, 0.0  ;;  %v418_v63 = vrot.slane %v413_v62, %v117_v45  ;;  %v422_v1 = vrot.slane %v413_v62, %v121_v57  ;;  %s685_s9 = sshll.u32 %s1071_s4, 4  ;;  %s686_s9 = int_to_ptr.vmem [resolvable:$true] %s685_s9 }
 0x136   :  { %v282_v6 = vmax.f32 %v208_v2, 0.0  ;;  %s1030_s10 = scalar_lea.vmem %s686_s9, 128  ;;  %p1035_p5 = scmp.lt.s32.totalorder %s686_s9, %s686_s9 }
 0x137   :  { %p1031_p4 = scmp.ne.s32.totalorder %s686_s9, %s1030_s10  ;;  %p1036_p6 = scmp.lt.s32.totalorder %s1030_s10, %s1030_s10 }
 0x138   :  { %489 = vmatprep.mubr.f32.mxu1 %v282_v6 }
 0x139   :  { %490 = vmatmul.mubr.f32.vlgmr.msra.gmra.mrb[0].mxu1 %v281_v5  ;;  %p1037_p7 = por %p1036_p6, %p1035_p5 }
 0x13a   :  { %897 = vmatpush3.bf16.msra.mxu1 %v896_v7 }
 0x13b   :  { %899 = vmatprep.subr.bf16.mxu1 %v898_v8  ;;  %p1038_p8 = pnand %p1037_p7, %p1031_p4 }
 0x13e   :  { %901 = vmatpush3.bf16.msra.mxu1 %v900_v12 }
 0x13f   :  { %903 = vmatprep.subr.bf16.mxu1 %v902_v14 }
 0x142   :  { %v276_v18 = vpop.f32.mrb[2].mxu0  ;;  %905 = vmatpush3.bf16.msra.mxu1 %v904_v26 }
 0x143   :  { %v277_v19 = vadd.f32 %v276_v18, %v126_v16  ;;  %v278_v20 = vpop.f32.mrb[3].mxu0  ;;  %907 = vmatprep.subr.bf16.mxu1 %v906_v29 }
 0x144   :  { %v279_v21 = vadd.f32 %v278_v20, %v130_v17 }
 0x145   :  { %v283_v23 = vmax.f32 %v277_v19, 0.0 }
 0x146   :  { %v284_v22 = vmax.f32 %v279_v21, 0.0  ;;  %909 = vmatpush3.bf16.msra.mxu1 %v908_v32 }
 0x147   :  { %911 = vmatprep.subr.bf16.mxu1 %v910_v36 }
 0x148   :  { %560 = vmatprep.mubr.f32.mxu0 %v284_v22 }
 0x149   :  { %561 = vmatmul.mubr.f32.vlgmr.msra.gmra.mrb[4].mxu0 %v283_v23 }
 0x14a   :  { %913 = vmatpush3.bf16.msra.mxu1 %v912_v40 }
 0x14b   :  { %915 = vmatprep.subr.bf16.mxu1 %v914_v41 }
 0x14e   :  { %917 = vmatpush3.bf16.msra.mxu1 %v916_v47 }
 0x14f   :  { %919 = vmatprep.subr.bf16.mxu1 %v918_v48 }
 0x152   :  { %921 = vmatpush3.bf16.msra.mxu1 %v920_v51 }
 0x153   :  { %923 = vmatprep.subr.bf16.mxu1 %v922_v54 }
 0x156   :  { %925 = vmatpush3.bf16.msra.mxu1 %v924_v59 }
 0x20c   :  { %v491_v60 = vpop.f32.mrb[0].mxu1 }
 0x20d   :  { %v493_v61 = vpop.f32.mrb[1].mxu1  ;;  %v492_v2 = vadd.f32 %v491_v60, %v418_v63 }
 0x20e   :  { %v494_v3 = vadd.f32 %v493_v61, %v422_v1 }
 0x21c   :  { %v562_v4 = vpop.f32.mrb[4].mxu0 }
 0x21d   :  { %v563_v5 = vadd.f32 %v562_v4, %v492_v2  ;;  %v564_v6 = vpop.f32.mrb[5].mxu0 }
 0x21e   :  { %v565_v7 = vadd.f32 %v564_v6, %v494_v3 }
 0x21f   :  { %v567_v9 = vmax.f32 %v563_v5, 0.0 }
 0x220   :  { %v568_v8 = vmax.f32 %v565_v7, 0.0 }
 0x222   :  { %672 = vmatprep.mubr.f32.mxu1 %v568_v8 }
 0x223   :  { %673 = vmatmul.mubr.f32.vlgmr.msra.gmra.mrb[2].mxu1 %v567_v9 }
 0x2f6   :  { %v731_v10 = vpop.f32.mrb[2].mxu1 }
 0x2f7   :  { %v732_v0 = vpop.f32.mrb[3].mxu1 }
 0x2f8   :  { %v733_v55 = vadd.f32 %v732_v0, %v731_v10 }
 0x2fa   :  { %v675_v45 = vadd.f32 %v733_v55, %v698_v11 }
 0x2fc   :  { %678 = vst [vmem:[#allocation10] sm:$0xff] %v675_v45 }
 0x2fd   :  { %1041 = shalt.err (!%p1038_p8)
}
 0x2fe   :  { %s1042_s0 = scalar_lea.hbm %s1210_s7, 128 }
 0x2ff   :  { %p1043_p9 = scmp.ne.s32.totalorder %s1210_s7, %s1042_s0  ;;  %p1046_p10 = scmp.lt.u32.totalorder %s1042_s0, %s1210_s7 }
 0x301   :  { %p1048_p11 = pnand %p1046_p10, %p1043_p9 }
 0x303   :  { %1051 = shalt.err (!%p1048_p11)
}
 0x304   :  { %688 = dma.vmem_to_hbm [thread:$0]  %s686_s9, 128, %s1210_s7, [#allocation4]  }
 0x305   :  { %1058 = dma.done.wait [#allocation4], 128  }
 0x306   :  { %1059 = vsyncadd [#allocation4], 4294967168 }
 0x307   :  { %692 = vsyncpa [#allocation3], 1 }
 0x308   :  { %693 = vsyncpa [#allocation6], 1 }
 0x309   :  { %694 = vsyncpa [#allocation9], 1 }
 0x30a   :  { %695 = vsyncpa [#allocation4], 1 }

</bundles_post_ra>
